<compile_context>
chip_gen: v7x
topology: tpu7x:2x2x1
jax: 0.10.0
libtpu: 0.0.40
codegen_flags: <defaults>
</compile_context>

<pallas_src>
import functools

import jax
import jax.numpy as jnp
from jax.experimental import pallas as pl
from jax.experimental.pallas import tpu as pltpu


def _round_up(x, m):
    return (x + m - 1) // m * m


def _pad_to(a, shape):
    pads = [(0, s - d) for d, s in zip(a.shape, shape)]
    if all(p == (0, 0) for p in pads):
        return a
    return jnp.pad(a, pads)


def actor_kernel(x_ref, w1_ref, b1_ref, w2_ref, b2_ref, w3_ref, b3_ref, o_ref):
    cdt = w1_ref.dtype  # compute dtype (bf16); accumulation is f32
    x = x_ref[...].astype(cdt)  # f32 -> bf16 cast done in-kernel (VPU, free-ish)
    # Layer 1: ReLU(x @ W1 + b1)
    h1 = jnp.dot(x, w1_ref[...], preferred_element_type=jnp.float32)
    h1 = jnp.maximum(h1 + b1_ref[...], 0.0).astype(cdt)
    # (dropout: identity in eval mode)
    # Layer 2: ReLU(h1 @ W2 + b2)
    h2 = jnp.dot(h1, w2_ref[...], preferred_element_type=jnp.float32)
    h2 = jnp.maximum(h2 + b2_ref[...], 0.0).astype(cdt)
    # (dropout: identity in eval mode)
    # Layer 3: h2 @ W3 + b3  (no activation)
    out = jnp.dot(h2, w3_ref[...], preferred_element_type=jnp.float32)
    o_ref[...] = (out + b3_ref[...]).astype(o_ref.dtype)


@functools.partial(jax.jit, static_argnames=("compute_dtype", "tile_b"))
def actor_forward(state, params, *, compute_dtype=jnp.bfloat16, tile_b=512):
    """state: [B, input_dim] float32. params: dict of w1,b1,w2,b2,w3,b3."""
    w1, b1, w2, b2, w3, b3 = (params["w1"], params["b1"], params["w2"],
                              params["b2"], params["w3"], params["b3"])
    B, D_in = state.shape
    H = w1.shape[1]
    D_out = w3.shape[1]

    # Hidden dim padded lane-dense (128); D_in / D_out kept at true width
    # (block dim == full array dim is legal and avoids extra HBM passes).
    H_p = _round_up(H, 128)

    # Batch tiling: big tiles amortize per-grid-step overhead; grid only over B.
    B8 = _round_up(B, 8)
    tb = min(tile_b, B8)
    B_p = _round_up(B8, tb)
    grid_b = B_p // tb

    # x stays f32 and un-padded in the feature dim; only pad batch if needed.
    x_p = _pad_to(state, (B_p, D_in))

    # Zero-padding of weights/biases is exact: padded W1 columns -> zero h1
    # lanes (bias pad is 0, ReLU(0)=0); padded W2/W3 rows contribute 0.
    w1_p = _pad_to(w1, (D_in, H_p)).astype(compute_dtype)
    w2_p = _pad_to(w2, (H_p, H_p)).astype(compute_dtype)
    w3_p = _pad_to(w3, (H_p, D_out)).astype(compute_dtype)
    b1_p = _pad_to(b1, (1, H_p)).astype(jnp.float32)
    b2_p = _pad_to(b2, (1, H_p)).astype(jnp.float32)
    b3_p = b3.astype(jnp.float32)

    # Constant index_map => DMA'd once, resident in VMEM across grid steps.
    resident = lambda shape: pl.BlockSpec(shape, lambda i: (0,) * len(shape))

    out = pl.pallas_call(
        actor_kernel,
        out_shape=jax.ShapeDtypeStruct((B_p, D_out), jnp.float32),
        grid=(grid_b,),
        in_specs=[
            pl.BlockSpec((tb, D_in), lambda i: (i, 0)),      # x: tiled over batch
            resident((D_in, H_p)), resident((1, H_p)),       # W1, b1 (stay in VMEM)
            resident((H_p, H_p)),  resident((1, H_p)),       # W2, b2
            resident((H_p, D_out)), resident((1, D_out)),    # W3, b3
        ],
        out_specs=pl.BlockSpec((tb, D_out), lambda i: (i, 0)),
        compiler_params=pltpu.CompilerParams(
            dimension_semantics=("parallel",),  # shard batch tiles across TCs (v7x)
        ),
    )(x_p, w1_p, b1_p, w2_p, b2_p, w3_p, b3_p)

    if B_p != B:
        out = out[:B]
    return out


def init_params(key, input_dim, output_dim, hidden_dim):
    """Deterministic init matching nn.Linear shapes (transposed for x @ W)."""
    k1, k2, k3, k4, k5, k6 = jax.random.split(key, 6)

    def lin(kw, kb, fan_in, fan_out):
        bound = 1.0 / jnp.sqrt(fan_in)
        w = jax.random.uniform(kw, (fan_in, fan_out), jnp.float32, -bound, bound)
        b = jax.random.uniform(kb, (1, fan_out), jnp.float32, -bound, bound)
        return w, b

    w1, b1 = lin(k1, k2, input_dim, hidden_dim)
    w2, b2 = lin(k3, k4, hidden_dim, hidden_dim)
    w3, b3 = lin(k5, k6, hidden_dim, output_dim)
    return {"w1": w1, "b1": b1, "w2": w2, "b2": b2, "w3": w3, "b3": b3}


def ref_forward_bf16(state, params, compute_dtype=jnp.bfloat16):
    """Reference mirroring the kernel's bf16-compute / f32-accumulate path."""
    cdt = compute_dtype
    x = state.astype(cdt)
    w1 = params["w1"].astype(cdt)
    w2 = params["w2"].astype(cdt)
    w3 = params["w3"].astype(cdt)
    h1 = jnp.maximum(
        jnp.dot(x, w1, preferred_element_type=jnp.float32) + params["b1"], 0.0
    ).astype(cdt)
    h2 = jnp.maximum(
        jnp.dot(h1, w2, preferred_element_type=jnp.float32) + params["b2"], 0.0
    ).astype(cdt)
    return jnp.dot(h2, w3, preferred_element_type=jnp.float32) + params["b3"]


def ref_forward_f32(state, params):
    """PyTorch-equivalent full-f32 reference (dropout = identity)."""
    h1 = jnp.maximum(state @ params["w1"] + params["b1"], 0.0)
    h2 = jnp.maximum(h1 @ params["w2"] + params["b2"], 0.0)
    return h2 @ params["w3"] + params["b3"]


if __name__ == "__main__":
    key = jax.random.PRNGKey(0)
    k_state, k_params = jax.random.split(key)

    batch = 1024        # many env states batched in one call (2 grid steps of 512)
    input_dim = 32      # state embedding dim
    hidden_dim = 32
    output_dim = 16     # action embedding dim

    state = jax.random.normal(k_state, (batch, input_dim), jnp.float32)
    params = init_params(k_params, input_dim, output_dim, hidden_dim)

    out = actor_forward(state, params)
    out = jax.block_until_ready(out)
    assert out.shape == (batch, output_dim)
    assert out.dtype == jnp.float32

    # Tight check against a reference using the same bf16-compute path.
    ref_bf16 = ref_forward_bf16(state, params)
    assert jnp.allclose(out, ref_bf16, atol=2e-3, rtol=2e-3), "mismatch vs bf16 reference"

    # Informational: deviation vs the pure-f32 PyTorch-equivalent forward.
    ref_f32 = ref_forward_f32(state, params)
    max_diff = float(jnp.max(jnp.abs(out - ref_f32)))
    print(f"max |out - f32_ref| = {max_diff:.3e}")

    print("KERNEL_OK")
</pallas_src>

<mosaic_0001>
module attributes {stable_mosaic.version = 11 : i64} {
  func.func @actor_kernel(%arg0: i32, %arg1: memref<512x32xf32, #tpu.memory_space<vmem>>, %arg2: memref<32x128xbf16, #tpu.memory_space<vmem>>, %arg3: memref<1x128xf32, #tpu.memory_space<vmem>>, %arg4: memref<128x128xbf16, #tpu.memory_space<vmem>>, %arg5: memref<1x128xf32, #tpu.memory_space<vmem>>, %arg6: memref<128x16xbf16, #tpu.memory_space<vmem>>, %arg7: memref<1x16xf32, #tpu.memory_space<vmem>>, %arg8: memref<512x16xf32, #tpu.memory_space<vmem>>) attributes {dimension_semantics = [#tpu.dimension_semantics<parallel>], iteration_bounds = array<i64: 2>, scalar_prefetch = 0 : i64, scratch_operands = 0 : i64, tpu.core_type = #tpu.core_type<tc>, window_params = [{transform_indices = @transform_0, window_bounds = array<i64: 512, 32>}, {pipeline_mode = #tpu.pipeline_mode<synchronous>, transform_indices = @transform_1, window_bounds = array<i64: 32, 128>}, {pipeline_mode = #tpu.pipeline_mode<synchronous>, transform_indices = @transform_2, window_bounds = array<i64: 1, 128>}, {pipeline_mode = #tpu.pipeline_mode<synchronous>, transform_indices = @transform_3, window_bounds = array<i64: 128, 128>}, {pipeline_mode = #tpu.pipeline_mode<synchronous>, transform_indices = @transform_4, window_bounds = array<i64: 1, 128>}, {pipeline_mode = #tpu.pipeline_mode<synchronous>, transform_indices = @transform_5, window_bounds = array<i64: 128, 16>}, {pipeline_mode = #tpu.pipeline_mode<synchronous>, transform_indices = @transform_6, window_bounds = array<i64: 1, 16>}, {transform_indices = @transform_7, window_bounds = array<i64: 512, 16>}]} {
    %c0 = arith.constant 0 : index
    %c0_0 = arith.constant 0 : index
    %0 = vector.load %arg1[%c0, %c0_0] : memref<512x32xf32, #tpu.memory_space<vmem>>, vector<512x32xf32>
    %1 = arith.truncf %0 : vector<512x32xf32> to vector<512x32xbf16>
    %c0_1 = arith.constant 0 : index
    %c0_2 = arith.constant 0 : index
    %2 = vector.load %arg2[%c0_1, %c0_2] : memref<32x128xbf16, #tpu.memory_space<vmem>>, vector<32x128xbf16>
    %cst = arith.constant dense<0.000000e+00> : vector<512x128xf32>
    %3 = tpu.matmul %1, %2, %cst {dimension_numbers = #tpu.dot_dimension_numbers<[1], [0], [0], [1], [0, 0, 1, 1], [], []>} : vector<512x32xbf16>, vector<32x128xbf16>, vector<512x128xf32> -> vector<512x128xf32>
    %c0_3 = arith.constant 0 : index
    %c0_4 = arith.constant 0 : index
    %4 = vector.load %arg3[%c0_3, %c0_4] : memref<1x128xf32, #tpu.memory_space<vmem>>, vector<1x128xf32>
    %5 = vector.broadcast %4 : vector<1x128xf32> to vector<512x128xf32>
    %6 = arith.addf %3, %5 : vector<512x128xf32>
    %cst_5 = arith.constant 0.000000e+00 : f32
    %7 = vector.broadcast %cst_5 : f32 to vector<512x128xf32>
    %8 = arith.maximumf %6, %7 : vector<512x128xf32>
    %9 = arith.truncf %8 : vector<512x128xf32> to vector<512x128xbf16>
    %c0_6 = arith.constant 0 : index
    %c0_7 = arith.constant 0 : index
    %10 = vector.load %arg4[%c0_6, %c0_7] : memref<128x128xbf16, #tpu.memory_space<vmem>>, vector<128x128xbf16>
    %cst_8 = arith.constant dense<0.000000e+00> : vector<512x128xf32>
    %11 = tpu.matmul %9, %10, %cst_8 {dimension_numbers = #tpu.dot_dimension_numbers<[1], [0], [0], [1], [0, 0, 1, 1], [], []>} : vector<512x128xbf16>, vector<128x128xbf16>, vector<512x128xf32> -> vector<512x128xf32>
    %c0_9 = arith.constant 0 : index
    %c0_10 = arith.constant 0 : index
    %12 = vector.load %arg5[%c0_9, %c0_10] : memref<1x128xf32, #tpu.memory_space<vmem>>, vector<1x128xf32>
    %13 = vector.broadcast %12 : vector<1x128xf32> to vector<512x128xf32>
    %14 = arith.addf %11, %13 : vector<512x128xf32>
    %cst_11 = arith.constant 0.000000e+00 : f32
    %15 = vector.broadcast %cst_11 : f32 to vector<512x128xf32>
    %16 = arith.maximumf %14, %15 : vector<512x128xf32>
    %17 = arith.truncf %16 : vector<512x128xf32> to vector<512x128xbf16>
    %c0_12 = arith.constant 0 : index
    %c0_13 = arith.constant 0 : index
    %18 = vector.load %arg6[%c0_12, %c0_13] : memref<128x16xbf16, #tpu.memory_space<vmem>>, vector<128x16xbf16>
    %cst_14 = arith.constant dense<0.000000e+00> : vector<512x16xf32>
    %19 = tpu.matmul %17, %18, %cst_14 {dimension_numbers = #tpu.dot_dimension_numbers<[1], [0], [0], [1], [0, 0, 1, 1], [], []>} : vector<512x128xbf16>, vector<128x16xbf16>, vector<512x16xf32> -> vector<512x16xf32>
    %c0_15 = arith.constant 0 : index
    %c0_16 = arith.constant 0 : index
    %20 = vector.load %arg7[%c0_15, %c0_16] : memref<1x16xf32, #tpu.memory_space<vmem>>, vector<1x16xf32>
    %21 = vector.broadcast %20 : vector<1x16xf32> to vector<512x16xf32>
    %22 = arith.addf %19, %21 : vector<512x16xf32>
    %c0_17 = arith.constant 0 : index
    %c0_18 = arith.constant 0 : index
    %23 = vector.load %arg8[%c0_17, %c0_18] : memref<512x16xf32, #tpu.memory_space<vmem>>, vector<512x16xf32>
    tpu.vector_store %arg8[%c0_17, %c0_18], %22 {strides = array<i32>} : memref<512x16xf32, #tpu.memory_space<vmem>>, vector<512x16xf32>,
    return
  }
  func.func @transform_0(%arg0: i32) -> (i32, i32) {
    %c0_i32 = arith.constant 0 : i32
    %c0_i32_0 = arith.constant 0 : i32
    return %arg0, %c0_i32 : i32, i32
  }
  func.func @transform_1(%arg0: i32) -> (i32, i32) {
    %c0_i32 = arith.constant 0 : i32
    %c0_i32_0 = arith.constant 0 : i32
    %c0_i32_1 = arith.constant 0 : i32
    return %c0_i32, %c0_i32_0 : i32, i32
  }
  func.func @transform_2(%arg0: i32) -> (i32, i32) {
    %c0_i32 = arith.constant 0 : i32
    %c0_i32_0 = arith.constant 0 : i32
    %c0_i32_1 = arith.constant 0 : i32
    return %c0_i32, %c0_i32_0 : i32, i32
  }
  func.func @transform_3(%arg0: i32) -> (i32, i32) {
    %c0_i32 = arith.constant 0 : i32
    %c0_i32_0 = arith.constant 0 : i32
    %c0_i32_1 = arith.constant 0 : i32
    return %c0_i32, %c0_i32_0 : i32, i32
  }
  func.func @transform_4(%arg0: i32) -> (i32, i32) {
    %c0_i32 = arith.constant 0 : i32
    %c0_i32_0 = arith.constant 0 : i32
    %c0_i32_1 = arith.constant 0 : i32
    return %c0_i32, %c0_i32_0 : i32, i32
  }
  func.func @transform_5(%arg0: i32) -> (i32, i32) {
    %c0_i32 = arith.constant 0 : i32
    %c0_i32_0 = arith.constant 0 : i32
    %c0_i32_1 = arith.constant 0 : i32
    return %c0_i32, %c0_i32_0 : i32, i32
  }
  func.func @transform_6(%arg0: i32) -> (i32, i32) {
    %c0_i32 = arith.constant 0 : i32
    %c0_i32_0 = arith.constant 0 : i32
    %c0_i32_1 = arith.constant 0 : i32
    return %c0_i32, %c0_i32_0 : i32, i32
  }
  func.func @transform_7(%arg0: i32) -> (i32, i32) {
    %c0_i32 = arith.constant 0 : i32
    %c0_i32_0 = arith.constant 0 : i32
    return %arg0, %c0_i32 : i32, i32
  }
}

</mosaic_0001>

<bundles_post_ra>
// kernel: actor_forward.1
= control target key start
LH: loop header
LB: loop body
LE: loop exit
PB: predicated region body
PF: predicated region fallthrough
CT: control target
= control target key end

     0   :  { %s2305_s24 = smov 0   ;;  %s2848_s0 = inlined_call_operand.vmem [shape: f32[1024,32], index: 0, kind: input, shape index: {}]   ;;  %s2849_s1 = inlined_call_operand.vmem [shape: bf16[32,128], index: 1, kind: input, shape index: {}]   ;;  %s2850_s2 = inlined_call_operand.vmem [shape: f32[1,128], index: 2, kind: input, shape index: {}]   ;;  %s2851_s3 = inlined_call_operand.vmem [shape: bf16[128,128], index: 3, kind: input, shape index: {}]   ;;  %s2852_s4 = inlined_call_operand.vmem [shape: f32[1,128], index: 4, kind: input, shape index: {}]   ;;  %s2853_s5 = inlined_call_operand.vmem [shape: bf16[128,16], index: 5, kind: input, shape index: {}]   ;;  %s2854_s6 = inlined_call_operand.vmem [shape: f32[1,16], index: 6, kind: input, shape index: {}]   ;;  %s2855_s7 = inlined_call_operand.vmem [shape: f32[1024,16], index: 7, kind: output, shape index: {}]  }
   0x1 LB: > { %s1821_s25 = sadd.s32 4294967295, %s2263_s24   ;;  %p1825_p0 = scmp.ge.s32.totalorder %s2263_s24, 1  ;;  %s2263_s24 = sphi %s2305_s24, %s17_s24  }
   0x2   : > { %p238_p1 = scmp.lt.s32.totalorder %s2263_s24, 3 }
   0x4   : > { %p239_p2 = pnand %p1825_p0, %p238_p1 }
   0x5   : > { %v2239_v0 = vld [vmem:[%s2849_s1] sm:$0xff] (!%p239_p2)   ;;  %s1826_s28 = sshll.u32 (!%p239_p2), %s1821_s25, 6  ;;  %v2240_v1 = vld [vmem:[%s2849_s1 + $0x8] sm:$0xff] (!%p239_p2)   ;;  %vm402_vm0 = vcmask (!%p239_p2), 261120   ;;  %v2243_v38 = vld [vmem:[%s2851_s3 + $0x10] sm:$0xff] (!%p239_p2)   ;;  %vm1700_vm1 = vcmask (!%p239_p2), 130048  }
   0x6   : > { %242 = sbr.rel (%p239_p2) target bundleno = 802 (0x322), region = 48  ;;  %p271_p3 = scmp.lt.s32.totalorder (!%p239_p2), %s1826_s28, 127  ;;  %1999 = vmatprep.subr.bf16.mxu0 (!%p239_p2), %v2239_v0  ;;  %2227 = vmatprep.subr.bf16.mxu1 (!%p239_p2), %v2239_v0  ;;  %v2241_v2 = vld [vmem:[%s2851_s3] sm:$0xff] (!%p239_p2)   ;;  %v2242_v29 = vld [vmem:[%s2851_s3 + $0x8] sm:$0xff] (!%p239_p2)   ;;  %v2244_v40 = vld [vmem:[%s2851_s3 + $0x18] sm:$0xff] (!%p239_p2)  }
   0x7   : > { %2000 = vmatpush3.bf16.msra.mxu0 (!%p239_p2), %v2239_v0  ;;  %2229 = vmatpush3.bf16.msra.mxu1 (!%p239_p2), %v2239_v0  ;;  %v2245_v50 = vld [vmem:[%s2851_s3 + $0x20] sm:$0xff] (!%p239_p2)   ;;  %v2246_v57 = vld [vmem:[%s2851_s3 + $0x28] sm:$0xff] (!%p239_p2)  }
   0x8   : > { %2001 = vmatprep.subr.bf16.mxu0 (!%p239_p2), %v2240_v1  ;;  %2228 = vmatprep.subr.bf16.mxu1 (!%p239_p2), %v2240_v1 }
   0xb   : > { %2002 = vmatpush3.bf16.msra.mxu0 (!%p239_p2), %v2240_v1  ;;  %2230 = vmatpush3.bf16.msra.mxu1 (!%p239_p2), %v2240_v1 }
   0xc   : > { %2067 = vmatprep.subr.bf16.mxu1 (!%p239_p2), %v2241_v2 }
   0xd   : > { %s2857_s28 = smov (!%p271_p3, %s1826_s28), 127 }
   0xe   : > { %s1827_s10 = sshll.u32 %s2857_s28, 3 }
   0xf   : > { %s2330_s13 = scalar_lea.vmem %s2848_s0, %s1827_s10  ;;  %s2651_s12 = scalar_lea.vmem %s2855_s7, %s1827_s10 }
  0x10   : > { %v283_v3 = vld [vmem:[%s2330_s13] sm:$0xff]  ;;  %v284_v4 = vld [vmem:[%s2330_s13 + $0x8] sm:$0xff]  ;;  %v285_v5 = vld [vmem:[%s2330_s13 + $0x10] sm:$0xff] }
  0x11   : > { %v347_v6 = vpack.c.bf16 %v284_v4, %v283_v3  ;;  %v286_v7 = vld [vmem:[%s2330_s13 + $0x18] sm:$0xff]  ;;  %v287_v8 = vld [vmem:[%s2330_s13 + $0x20] sm:$0xff]  ;;  %v288_v9 = vld [vmem:[%s2330_s13 + $0x28] sm:$0xff] }
  0x12   : > { %v348_v10 = vpack.c.bf16 %v286_v7, %v285_v5  ;;  %v349_v11 = vpack.c.bf16 %v288_v9, %v287_v8  ;;  %v289_v12 = vld [vmem:[%s2330_s13 + $0x30] sm:$0xff]  ;;  %v290_v13 = vld [vmem:[%s2330_s13 + $0x38] sm:$0xff]  ;;  %v291_v14 = vld [vmem:[%s2330_s13 + $0x40] sm:$0xff] }
  0x13   : > { %2003 = vmatprep.mubr.msk.bf16.mxu0 %vm402_vm0, %v347_v6  ;;  %v292_v15 = vld [vmem:[%s2330_s13 + $0x48] sm:$0xff]  ;;  %v350_v16 = vpack.c.bf16 %v290_v13, %v289_v12  ;;  %v315_v18 = vld [vmem:[%s2330_s13 + $0x100] sm:$0xff]  ;;  %v317_v20 = vld [vmem:[%s2330_s13 + $0x110] sm:$0xff] }
  0x14   : > { %2004 = vmatmul.mubr.msk.bf16.vlgmr.msra.gmra.mrb[0].mxu0 %vm402_vm0, %v348_v10  ;;  %v351_v17 = vpack.c.bf16 %v292_v15, %v291_v14  ;;  %v316_v19 = vld [vmem:[%s2330_s13 + $0x108] sm:$0xff]  ;;  %v318_v21 = vld [vmem:[%s2330_s13 + $0x118] sm:$0xff]  ;;  %v319_v24 = vld [vmem:[%s2330_s13 + $0x120] sm:$0xff] }
  0x15   : > { %2007 = vmatprep.mubr.msk.bf16.mxu0 %vm402_vm0, %v349_v11  ;;  %v363_v22 = vpack.c.bf16 %v316_v19, %v315_v18  ;;  %v364_v23 = vpack.c.bf16 %v318_v21, %v317_v20  ;;  %v320_v25 = vld [vmem:[%s2330_s13 + $0x128] sm:$0xff]  ;;  %v293_v26 = vld [vmem:[%s2330_s13 + $0x50] sm:$0xff]  ;;  %v294_v27 = vld [vmem:[%s2330_s13 + $0x58] sm:$0xff] }
  0x16   : > { %v365_v28 = vpack.c.bf16 %v320_v25, %v319_v24  ;;  %v295_v30 = vld [vmem:[%s2330_s13 + $0x60] sm:$0xff]  ;;  %v296_v31 = vld [vmem:[%s2330_s13 + $0x68] sm:$0xff]  ;;  %v352_v32 = vpack.c.bf16 %v294_v27, %v293_v26  ;;  %v321_v33 = vld [vmem:[%s2330_s13 + $0x130] sm:$0xff] }
  0x17   : > { %2035 = vmatprep.mubr.msk.bf16.mxu1 %vm402_vm0, %v363_v22  ;;  %v322_v34 = vld [vmem:[%s2330_s13 + $0x138] sm:$0xff]  ;;  %v353_v35 = vpack.c.bf16 %v296_v31, %v295_v30  ;;  %v323_v36 = vld [vmem:[%s2330_s13 + $0x140] sm:$0xff]  ;;  %v324_v37 = vld [vmem:[%s2330_s13 + $0x148] sm:$0xff] }
  0x18   : > { %2036 = vmatmul.mubr.msk.bf16.vlgmr.msra.gmra.mrb[0].mxu1 %vm402_vm0, %v364_v23  ;;  %v366_v39 = vpack.c.bf16 %v322_v34, %v321_v33  ;;  %v297_v41 = vld [vmem:[%s2330_s13 + $0x70] sm:$0xff]  ;;  %v298_v42 = vld [vmem:[%s2330_s13 + $0x78] sm:$0xff]  ;;  %v299_v43 = vld [vmem:[%s2330_s13 + $0x80] sm:$0xff]  ;;  %v367_v44 = vpack.c.bf16 %v324_v37, %v323_v36 }
  0x19   : > { %2039 = vmatprep.mubr.msk.bf16.mxu1 %vm402_vm0, %v365_v28  ;;  %2068 = vmatpush3.bf16.msra.mxu1 %v2241_v2  ;;  %v300_v45 = vld [vmem:[%s2330_s13 + $0x88] sm:$0xff]  ;;  %v325_v46 = vld [vmem:[%s2330_s13 + $0x150] sm:$0xff]  ;;  %v326_v47 = vld [vmem:[%s2330_s13 + $0x158] sm:$0xff]  ;;  %v354_v51 = vpack.c.bf16 %v298_v42, %v297_v41 }
  0x1a   : > { %2069 = vmatprep.subr.bf16.mxu1 %v2242_v29  ;;  %v327_v48 = vld [vmem:[%s2330_s13 + $0x160] sm:$0xff]  ;;  %v328_v49 = vld [vmem:[%s2330_s13 + $0x168] sm:$0xff]  ;;  %v355_v52 = vpack.c.bf16 %v300_v45, %v299_v43  ;;  %v301_v53 = vld [vmem:[%s2330_s13 + $0x90] sm:$0xff]  ;;  %v368_v54 = vpack.c.bf16 %v326_v47, %v325_v46 }
  0x1b   : > { %v369_v55 = vpack.c.bf16 %v328_v49, %v327_v48  ;;  %v302_v56 = vld [vmem:[%s2330_s13 + $0x98] sm:$0xff]  ;;  %v303_v58 = vld [vmem:[%s2330_s13 + $0xa0] sm:$0xff]  ;;  %v304_v59 = vld [vmem:[%s2330_s13 + $0xa8] sm:$0xff] }
  0x1c   : > { %2008 = vmatmul.mubr.msk.bf16.gmra.mrb[4].mxu0 %vm402_vm0, %v350_v16  ;;  %v356_v60 = vpack.c.bf16 %v302_v56, %v301_v53  ;;  %v329_v61 = vld [vmem:[%s2330_s13 + $0x170] sm:$0xff]  ;;  %v330_v62 = vld [vmem:[%s2330_s13 + $0x178] sm:$0xff]  ;;  %v357_v63 = vpack.c.bf16 %v304_v59, %v303_v58  ;;  %v331_v0 = vld [vmem:[%s2330_s13 + $0x180] sm:$0xff] }
  0x1d   : > { %2011 = vmatprep.mubr.msk.bf16.mxu0 %vm402_vm0, %v351_v17  ;;  %2070 = vmatpush3.bf16.msra.mxu1 %v2242_v29  ;;  %v332_v1 = vld [vmem:[%s2330_s13 + $0x188] sm:$0xff]  ;;  %v2247_v2 = vld [vmem:[%s2851_s3 + $0x30] sm:$0xff]   ;;  %v370_v3 = vpack.c.bf16 %v330_v62, %v329_v61  ;;  %v306_v6 = vld [vmem:[%s2330_s13 + $0xb8] sm:$0xff] }
  0x1e   : > { %2071 = vmatprep.subr.bf16.mxu1 %v2243_v38  ;;  %v371_v4 = vpack.c.bf16 %v332_v1, %v331_v0  ;;  %v305_v5 = vld [vmem:[%s2330_s13 + $0xb0] sm:$0xff]  ;;  %v307_v7 = vld [vmem:[%s2330_s13 + $0xc0] sm:$0xff]  ;;  %v308_v8 = vld [vmem:[%s2330_s13 + $0xc8] sm:$0xff] }
  0x1f   : > { %v358_v9 = vpack.c.bf16 %v306_v6, %v305_v5  ;;  %v333_v10 = vld [vmem:[%s2330_s13 + $0x190] sm:$0xff]  ;;  %v334_v11 = vld [vmem:[%s2330_s13 + $0x198] sm:$0xff]  ;;  %v359_v12 = vpack.c.bf16 %v308_v8, %v307_v7  ;;  %v335_v13 = vld [vmem:[%s2330_s13 + $0x1a0] sm:$0xff] }
  0x20   : > { %2040 = vmatmul.mubr.msk.bf16.gmra.mrb[4].mxu1 %vm402_vm0, %v366_v39  ;;  %v336_v14 = vld [vmem:[%s2330_s13 + $0x1a8] sm:$0xff]  ;;  %v372_v15 = vpack.c.bf16 %v334_v11, %v333_v10  ;;  %v309_v17 = vld [vmem:[%s2330_s13 + $0xd0] sm:$0xff]  ;;  %v310_v18 = vld [vmem:[%s2330_s13 + $0xd8] sm:$0xff] }
  0x21   : > { %2043 = vmatprep.mubr.msk.bf16.mxu1 %vm402_vm0, %v367_v44  ;;  %2072 = vmatpush3.bf16.msra.mxu1 %v2243_v38  ;;  %v373_v16 = vpack.c.bf16 %v336_v14, %v335_v13  ;;  %v311_v19 = vld [vmem:[%s2330_s13 + $0xe0] sm:$0xff]  ;;  %v312_v20 = vld [vmem:[%s2330_s13 + $0xe8] sm:$0xff]  ;;  %v360_v21 = vpack.c.bf16 %v310_v18, %v309_v17  ;;  %v337_v22 = vld [vmem:[%s2330_s13 + $0x1b0] sm:$0xff] }
  0x22   : > { %2073 = vmatprep.subr.bf16.mxu1 %v2244_v40  ;;  %v338_v23 = vld [vmem:[%s2330_s13 + $0x1b8] sm:$0xff]  ;;  %v361_v24 = vpack.c.bf16 %v312_v20, %v311_v19  ;;  %v339_v25 = vld [vmem:[%s2330_s13 + $0x1c0] sm:$0xff]  ;;  %v340_v26 = vld [vmem:[%s2330_s13 + $0x1c8] sm:$0xff] }
  0x23   : > { %v374_v27 = vpack.c.bf16 %v338_v23, %v337_v22  ;;  %v375_v28 = vpack.c.bf16 %v340_v26, %v339_v25  ;;  %v313_v29 = vld [vmem:[%s2330_s13 + $0xf0] sm:$0xff]  ;;  %v314_v30 = vld [vmem:[%s2330_s13 + $0xf8] sm:$0xff]  ;;  %v343_v34 = vld [vmem:[%s2330_s13 + $0x1e0] sm:$0xff] }
  0x24   : > { %2012 = vmatmul.mubr.msk.bf16.gmra.mrb[8].mxu0 %vm402_vm0, %v352_v32  ;;  %v362_v31 = vpack.c.bf16 %v314_v30, %v313_v29  ;;  %v341_v32 = vld [vmem:[%s2330_s13 + $0x1d0] sm:$0xff]  ;;  %v342_v33 = vld [vmem:[%s2330_s13 + $0x1d8] sm:$0xff]  ;;  %v2452_v42 = vld [vmem:[%s2850_s2] ss:$0 sm:$0xff] }
  0x25   : > { %2015 = vmatprep.mubr.msk.bf16.mxu0 %vm402_vm0, %v353_v35  ;;  %2074 = vmatpush3.bf16.msra.mxu1 %v2244_v40  ;;  %v344_v35 = vld [vmem:[%s2330_s13 + $0x1e8] sm:$0xff]  ;;  %v376_v36 = vpack.c.bf16 %v342_v33, %v341_v32  ;;  %v345_v38 = vld [vmem:[%s2330_s13 + $0x1f0] sm:$0xff]  ;;  %v346_v39 = vld [vmem:[%s2330_s13 + $0x1f8] sm:$0xff] }
  0x26   : > { %2075 = vmatprep.subr.bf16.mxu1 %v2245_v50  ;;  %v377_v37 = vpack.c.bf16 %v344_v35, %v343_v34  ;;  %v378_v40 = vpack.c.bf16 %v346_v39, %v345_v38  ;;  %v2248_v41 = vld [vmem:[%s2851_s3 + $0x38] sm:$0xff]   ;;  %v2251_v58 = vld [vmem:[%s2853_s5 + $0x10] sm:$0xff]   ;;  %v2253_v20 = vld [vmem:[%s2853_s5 + $0x20] sm:$0xff]  }
  0x27   : > { %v2254_v34 = vld [vmem:[%s2853_s5 + $0x28] sm:$0xff]  }
  0x28   : > { %2044 = vmatmul.mubr.msk.bf16.gmra.mrb[8].mxu1 %vm402_vm0, %v368_v54 }
  0x29   : > { %2047 = vmatprep.mubr.msk.bf16.mxu1 %vm402_vm0, %v369_v55  ;;  %2076 = vmatpush3.bf16.msra.mxu1 %v2245_v50  ;;  %v2249_v50 = vld [vmem:[%s2853_s5] sm:$0xff]  }
  0x2a   : > { %2077 = vmatprep.subr.bf16.mxu1 %v2246_v57  ;;  %2147 = vmatprep.subr.bf16.mxu0 %v2249_v50 }
  0x2b   : > { %2148 = vmatpush3.bf16.msra.mxu0 %v2249_v50 }
  0x2c   : > { %2016 = vmatmul.mubr.msk.bf16.gmra.mrb[12].mxu0 %vm402_vm0, %v354_v51  ;;  %v2250_v51 = vld [vmem:[%s2853_s5 + $0x8] sm:$0xff]  }
  0x2d   : > { %2019 = vmatprep.mubr.msk.bf16.mxu0 %vm402_vm0, %v355_v52  ;;  %2078 = vmatpush3.bf16.msra.mxu1 %v2246_v57 }
  0x2e   : > { %2079 = vmatprep.subr.bf16.mxu1 %v2247_v2  ;;  %2149 = vmatprep.subr.bf16.mxu0 %v2250_v51 }
  0x2f   : > { %2150 = vmatpush3.bf16.msra.mxu0 %v2250_v51  ;;  %v2255_v51 = vld [vmem:[%s2853_s5 + $0x30] sm:$0xff]  }
  0x30   : > { %2048 = vmatmul.mubr.msk.bf16.gmra.mrb[12].mxu1 %vm402_vm0, %v370_v3  ;;  %2151 = vmatprep.subr.bf16.mxu0 %v2251_v58 }
  0x31   : > { %2051 = vmatprep.mubr.msk.bf16.mxu1 %vm402_vm0, %v371_v4  ;;  %2080 = vmatpush3.bf16.msra.mxu1 %v2247_v2  ;;  %v2252_v4 = vld [vmem:[%s2853_s5 + $0x18] sm:$0xff]  }
  0x32   : > { %2081 = vmatprep.subr.bf16.mxu1 %v2248_v41 }
  0x33   : > { %2152 = vmatpush3.bf16.msra.mxu0 %v2251_v58 }
  0x34   : > { %2020 = vmatmul.mubr.msk.bf16.gmra.mrb[16].mxu0 %vm402_vm0, %v356_v60  ;;  %2153 = vmatprep.subr.bf16.mxu0 %v2252_v4 }
  0x35   : > { %2023 = vmatprep.mubr.msk.bf16.mxu0 %vm402_vm0, %v357_v63  ;;  %2082 = vmatpush3.bf16.msra.mxu1 %v2248_v41 }
  0x37   : > { %2154 = vmatpush3.bf16.msra.mxu0 %v2252_v4 }
  0x38   : > { %2052 = vmatmul.mubr.msk.bf16.gmra.mrb[16].mxu1 %vm402_vm0, %v372_v15  ;;  %2155 = vmatprep.subr.bf16.mxu0 %v2253_v20 }
  0x39   : > { %2055 = vmatprep.mubr.msk.bf16.mxu1 %vm402_vm0, %v373_v16 }
  0x3b   : > { %2156 = vmatpush3.bf16.msra.mxu0 %v2253_v20 }
  0x3c   : > { %2024 = vmatmul.mubr.msk.bf16.gmra.mrb[20].mxu0 %vm402_vm0, %v358_v9  ;;  %2157 = vmatprep.subr.bf16.mxu0 %v2254_v34 }
  0x3d   : > { %2027 = vmatprep.mubr.msk.bf16.mxu0 %vm402_vm0, %v359_v12 }
  0x3f   : > { %2158 = vmatpush3.bf16.msra.mxu0 %v2254_v34 }
  0x40   : > { %2056 = vmatmul.mubr.msk.bf16.gmra.mrb[20].mxu1 %vm402_vm0, %v374_v27  ;;  %2159 = vmatprep.subr.bf16.mxu0 %v2255_v51 }
  0x41   : > { %2059 = vmatprep.mubr.msk.bf16.mxu1 %vm402_vm0, %v375_v28 }
  0x43   : > { %2160 = vmatpush3.bf16.msra.mxu0 %v2255_v51 }
  0x44   : > { %2028 = vmatmul.mubr.msk.bf16.gmra.mrb[24].mxu0 %vm402_vm0, %v360_v21 }
  0x45   : > { %2031 = vmatprep.mubr.msk.bf16.mxu0 %vm402_vm0, %v361_v24 }
  0x48   : > { %2060 = vmatmul.mubr.msk.bf16.gmra.mrb[24].mxu1 %vm402_vm0, %v376_v36 }
  0x49   : > { %2063 = vmatprep.mubr.msk.bf16.mxu1 %vm402_vm0, %v377_v37 }
  0x4c   : > { %2032 = vmatmul.mubr.msk.bf16.gmra.mrb[28].mxu0 %vm402_vm0, %v362_v31 }
  0x50   : > { %2064 = vmatmul.mubr.msk.bf16.gmra.mrb[28].mxu1 %vm402_vm0, %v378_v40 }
  0xe7   : > { %v2005_v43 = vpop.f32.mrb[0].mxu0 }
  0xe8   : > { %v542_v44 = vadd.f32 %v2005_v43, %v2452_v42  ;;  %v533_v45 = vpop.f32.mrb[1].mxu0 }
  0xe9   : > { %v534_v46 = vadd.f32 %v2452_v42, %v533_v45  ;;  %v2006_v47 = vpop.f32.mrb[2].mxu0 }
  0xea   : > { %v545_v48 = vadd.f32 %v2006_v47, %v2452_v42  ;;  %v536_v49 = vpop.f32.mrb[3].mxu0  ;;  %v790_v53 = vmax.f32 %v542_v44, 0.0 }
  0xeb   : > { %v537_v52 = vadd.f32 %v2452_v42, %v536_v49  ;;  %v788_v55 = vmax.f32 %v534_v46, 0.0  ;;  %v2037_v3 = vpop.f32.mrb[0].mxu1 }
  0xec   : > { %v791_v54 = vmax.f32 %v545_v48, 0.0  ;;  %v670_v6 = vadd.f32 %v2037_v3, %v2452_v42  ;;  %v661_v7 = vpop.f32.mrb[1].mxu1 }
  0xed   : > { %v789_v56 = vmax.f32 %v537_v52, 0.0  ;;  %v662_v10 = vadd.f32 %v2452_v42, %v661_v7  ;;  %v2038_v11 = vpop.f32.mrb[2].mxu1 }
  0xee   : > { %v853_v57 = vpack.c.bf16 %v791_v54, %v790_v53  ;;  %v822_v14 = vmax.f32 %v670_v6, 0.0  ;;  %v673_v15 = vadd.f32 %v2038_v11, %v2452_v42  ;;  %v664_v16 = vpop.f32.mrb[3].mxu1 }
  0xef   : > { %v852_v59 = vpack.c.bf16 %v789_v56, %v788_v55  ;;  %v2009_v60 = vpop.f32.mrb[4].mxu0  ;;  %v820_v18 = vmax.f32 %v662_v10, 0.0  ;;  %v665_v19 = vadd.f32 %v2452_v42, %v664_v16 }
  0xf0   : > { %v558_v61 = vadd.f32 %v2009_v60, %v2452_v42  ;;  %v549_v62 = vpop.f32.mrb[5].mxu0  ;;  %v823_v23 = vmax.f32 %v673_v15, 0.0 }
  0xf1   : > { %v550_v63 = vadd.f32 %v2452_v42, %v549_v62  ;;  %v2010_v0 = vpop.f32.mrb[6].mxu0  ;;  %2083 = vmatprep.mubr.bf16.mxu1 %v852_v59  ;;  %v821_v26 = vmax.f32 %v665_v19, 0.0 }
  0xf2   : > { %v561_v1 = vadd.f32 %v2010_v0, %v2452_v42  ;;  %v552_v2 = vpop.f32.mrb[7].mxu0  ;;  %2084 = vmatmul.mubr.bf16.vlgmr.msra.gmra.mrb[32].mxu1 %v853_v57  ;;  %v794_v8 = vmax.f32 %v558_v61, 0.0  ;;  %v2483_v29 = vpack.c.bf16 %v823_v23, %v822_v14 }
  0xf3   : > { %v553_v5 = vadd.f32 %v2452_v42, %v552_v2  ;;  %v792_v12 = vmax.f32 %v550_v63, 0.0  ;;  %v2486_v32 = vpack.c.bf16 %v821_v26, %v820_v18  ;;  %v2041_v33 = vpop.f32.mrb[4].mxu1 }
  0xf4   : > { %v795_v9 = vmax.f32 %v561_v1, 0.0  ;;  %v686_v36 = vadd.f32 %v2041_v33, %v2452_v42  ;;  %v677_v37 = vpop.f32.mrb[5].mxu1 }
  0xf5   : > { %v793_v13 = vmax.f32 %v553_v5, 0.0  ;;  %v678_v40 = vadd.f32 %v2452_v42, %v677_v37  ;;  %v2042_v41 = vpop.f32.mrb[6].mxu1 }
  0xf6   : > { %v855_v17 = vpack.c.bf16 %v795_v9, %v794_v8  ;;  %v826_v45 = vmax.f32 %v686_v36, 0.0  ;;  %v689_v46 = vadd.f32 %v2042_v41, %v2452_v42  ;;  %v680_v47 = vpop.f32.mrb[7].mxu1 }
  0xf7   : > { %v854_v21 = vpack.c.bf16 %v793_v13, %v792_v12  ;;  %v2013_v22 = vpop.f32.mrb[8].mxu0  ;;  %v824_v49 = vmax.f32 %v678_v40, 0.0  ;;  %v681_v50 = vadd.f32 %v2452_v42, %v680_v47 }
  0xf8   : > { %v574_v24 = vadd.f32 %v2013_v22, %v2452_v42  ;;  %v565_v25 = vpop.f32.mrb[9].mxu0  ;;  %v827_v54 = vmax.f32 %v689_v46, 0.0 }
  0xf9   : > { %v566_v27 = vadd.f32 %v2452_v42, %v565_v25  ;;  %v2014_v28 = vpop.f32.mrb[10].mxu0  ;;  %2087 = vmatprep.mubr.bf16.mxu1 %v854_v21  ;;  %v825_v57 = vmax.f32 %v681_v50, 0.0 }
  0xfa   : > { %v577_v30 = vadd.f32 %v2014_v28, %v2452_v42  ;;  %v568_v31 = vpop.f32.mrb[11].mxu0  ;;  %2088 = vmatmul.mubr.bf16.gmra.mrb[36].mxu1 %v855_v17  ;;  %v798_v38 = vmax.f32 %v574_v24, 0.0  ;;  %v2501_v60 = vpack.c.bf16 %v827_v54, %v826_v45 }
  0xfb   : > { %v569_v35 = vadd.f32 %v2452_v42, %v568_v31  ;;  %v796_v43 = vmax.f32 %v566_v27, 0.0  ;;  %v2504_v63 = vpack.c.bf16 %v825_v57, %v824_v49  ;;  %v2045_v0 = vpop.f32.mrb[8].mxu1 }
  0xfc   : > { %v799_v39 = vmax.f32 %v577_v30, 0.0  ;;  %v702_v2 = vadd.f32 %v2045_v0, %v2452_v42  ;;  %v693_v3 = vpop.f32.mrb[9].mxu1 }
  0xfd   : > { %v797_v44 = vmax.f32 %v569_v35, 0.0  ;;  %v694_v6 = vadd.f32 %v2452_v42, %v693_v3  ;;  %v2046_v7 = vpop.f32.mrb[10].mxu1 }
  0xfe   : > { %v857_v48 = vpack.c.bf16 %v799_v39, %v798_v38  ;;  %v830_v10 = vmax.f32 %v702_v2, 0.0  ;;  %v705_v11 = vadd.f32 %v2046_v7, %v2452_v42  ;;  %v696_v12 = vpop.f32.mrb[11].mxu1 }
  0xff   : > { %v856_v52 = vpack.c.bf16 %v797_v44, %v796_v43  ;;  %v2017_v53 = vpop.f32.mrb[12].mxu0  ;;  %v828_v14 = vmax.f32 %v694_v6, 0.0  ;;  %v697_v15 = vadd.f32 %v2452_v42, %v696_v12 }
 0x100   : > { %v590_v55 = vadd.f32 %v2017_v53, %v2452_v42  ;;  %v581_v56 = vpop.f32.mrb[13].mxu0  ;;  %v831_v18 = vmax.f32 %v705_v11, 0.0 }
 0x101   : > { %v582_v58 = vadd.f32 %v2452_v42, %v581_v56  ;;  %v2018_v59 = vpop.f32.mrb[14].mxu0  ;;  %2091 = vmatprep.mubr.bf16.mxu1 %v856_v52  ;;  %v829_v21 = vmax.f32 %v697_v15, 0.0 }
 0x102   : > { %v593_v61 = vadd.f32 %v2018_v59, %v2452_v42  ;;  %v584_v62 = vpop.f32.mrb[15].mxu0  ;;  %2092 = vmatmul.mubr.bf16.gmra.mrb[40].mxu1 %v857_v48  ;;  %v802_v4 = vmax.f32 %v590_v55, 0.0  ;;  %v2513_v24 = vpack.c.bf16 %v831_v18, %v830_v10 }
 0x103   : > { %v585_v1 = vadd.f32 %v2452_v42, %v584_v62  ;;  %v800_v8 = vmax.f32 %v582_v58, 0.0  ;;  %v2516_v27 = vpack.c.bf16 %v829_v21, %v828_v14  ;;  %v2049_v28 = vpop.f32.mrb[12].mxu1 }
 0x104   : > { %v803_v5 = vmax.f32 %v593_v61, 0.0  ;;  %v718_v31 = vadd.f32 %v2049_v28, %v2452_v42  ;;  %v709_v33 = vpop.f32.mrb[13].mxu1 }
 0x105   : > { %v801_v9 = vmax.f32 %v585_v1, 0.0  ;;  %v710_v36 = vadd.f32 %v2452_v42, %v709_v33  ;;  %v2050_v37 = vpop.f32.mrb[14].mxu1 }
 0x106   : > { %v859_v13 = vpack.c.bf16 %v803_v5, %v802_v4  ;;  %v834_v40 = vmax.f32 %v718_v31, 0.0  ;;  %v721_v41 = vadd.f32 %v2050_v37, %v2452_v42  ;;  %v712_v43 = vpop.f32.mrb[15].mxu1 }
 0x107   : > { %v858_v16 = vpack.c.bf16 %v801_v9, %v800_v8  ;;  %v2021_v17 = vpop.f32.mrb[16].mxu0  ;;  %v832_v45 = vmax.f32 %v710_v36, 0.0  ;;  %v713_v46 = vadd.f32 %v2452_v42, %v712_v43 }
 0x108   : > { %v606_v19 = vadd.f32 %v2021_v17, %v2452_v42  ;;  %v597_v20 = vpop.f32.mrb[17].mxu0  ;;  %v835_v49 = vmax.f32 %v721_v41, 0.0 }
 0x109   : > { %v598_v22 = vadd.f32 %v2452_v42, %v597_v20  ;;  %v2022_v23 = vpop.f32.mrb[18].mxu0  ;;  %2095 = vmatprep.mubr.bf16.mxu1 %v858_v16  ;;  %v833_v52 = vmax.f32 %v713_v46, 0.0 }
 0x10a   : > { %v609_v25 = vadd.f32 %v2022_v23, %v2452_v42  ;;  %v600_v26 = vpop.f32.mrb[19].mxu0  ;;  %2096 = vmatmul.mubr.bf16.gmra.mrb[44].mxu1 %v859_v13  ;;  %v806_v34 = vmax.f32 %v606_v19, 0.0  ;;  %v2525_v55 = vpack.c.bf16 %v835_v49, %v834_v40 }
 0x10b   : > { %v601_v30 = vadd.f32 %v2452_v42, %v600_v26  ;;  %v804_v38 = vmax.f32 %v598_v22, 0.0  ;;  %v2528_v58 = vpack.c.bf16 %v833_v52, %v832_v45  ;;  %v2053_v59 = vpop.f32.mrb[16].mxu1 }
 0x10c   : > { %v807_v35 = vmax.f32 %v609_v25, 0.0  ;;  %v734_v62 = vadd.f32 %v2053_v59, %v2452_v42  ;;  %v725_v0 = vpop.f32.mrb[17].mxu1 }
 0x10d   : > { %v805_v39 = vmax.f32 %v601_v30, 0.0  ;;  %v726_v3 = vadd.f32 %v2452_v42, %v725_v0  ;;  %v2054_v4 = vpop.f32.mrb[18].mxu1 }
 0x10e   : > { %v861_v44 = vpack.c.bf16 %v807_v35, %v806_v34  ;;  %v838_v7 = vmax.f32 %v734_v62, 0.0  ;;  %v737_v8 = vadd.f32 %v2054_v4, %v2452_v42  ;;  %v728_v9 = vpop.f32.mrb[19].mxu1 }
 0x10f   : > { %v860_v47 = vpack.c.bf16 %v805_v39, %v804_v38  ;;  %v2025_v48 = vpop.f32.mrb[20].mxu0  ;;  %v836_v11 = vmax.f32 %v726_v3, 0.0  ;;  %v729_v12 = vadd.f32 %v2452_v42, %v728_v9 }
 0x110   : > { %v622_v50 = vadd.f32 %v2025_v48, %v2452_v42  ;;  %v613_v51 = vpop.f32.mrb[21].mxu0  ;;  %v839_v15 = vmax.f32 %v737_v8, 0.0 }
 0x111   : > { %v614_v53 = vadd.f32 %v2452_v42, %v613_v51  ;;  %v2026_v54 = vpop.f32.mrb[22].mxu0  ;;  %2099 = vmatprep.mubr.bf16.mxu1 %v860_v47  ;;  %v837_v18 = vmax.f32 %v729_v12, 0.0 }
 0x112   : > { %v625_v56 = vadd.f32 %v2026_v54, %v2452_v42  ;;  %v616_v57 = vpop.f32.mrb[23].mxu0  ;;  %2100 = vmatmul.mubr.bf16.gmra.mrb[48].mxu1 %v861_v44  ;;  %v810_v1 = vmax.f32 %v622_v50, 0.0  ;;  %v2537_v21 = vpack.c.bf16 %v839_v15, %v838_v7 }
 0x113   : > { %v617_v61 = vadd.f32 %v2452_v42, %v616_v57  ;;  %v808_v5 = vmax.f32 %v614_v53, 0.0  ;;  %v2540_v25 = vpack.c.bf16 %v837_v18, %v836_v11  ;;  %v2057_v26 = vpop.f32.mrb[20].mxu1 }
 0x114   : > { %v811_v2 = vmax.f32 %v625_v56, 0.0  ;;  %v750_v30 = vadd.f32 %v2057_v26, %v2452_v42  ;;  %v741_v31 = vpop.f32.mrb[21].mxu1 }
 0x115   : > { %v809_v6 = vmax.f32 %v617_v61, 0.0  ;;  %v742_v35 = vadd.f32 %v2452_v42, %v741_v31  ;;  %v2058_v36 = vpop.f32.mrb[22].mxu1 }
 0x116   : > { %v863_v10 = vpack.c.bf16 %v811_v2, %v810_v1  ;;  %v842_v39 = vmax.f32 %v750_v30, 0.0  ;;  %v753_v40 = vadd.f32 %v2058_v36, %v2452_v42  ;;  %v744_v41 = vpop.f32.mrb[23].mxu1 }
 0x117   : > { %v862_v13 = vpack.c.bf16 %v809_v6, %v808_v5  ;;  %v2029_v14 = vpop.f32.mrb[24].mxu0  ;;  %v840_v44 = vmax.f32 %v742_v35, 0.0  ;;  %v745_v45 = vadd.f32 %v2452_v42, %v744_v41 }
 0x118   : > { %v638_v16 = vadd.f32 %v2029_v14, %v2452_v42  ;;  %v629_v17 = vpop.f32.mrb[25].mxu0  ;;  %v843_v48 = vmax.f32 %v753_v40, 0.0 }
 0x119   : > { %v630_v19 = vadd.f32 %v2452_v42, %v629_v17  ;;  %v2030_v20 = vpop.f32.mrb[26].mxu0  ;;  %2103 = vmatprep.mubr.bf16.mxu1 %v862_v13  ;;  %v841_v51 = vmax.f32 %v745_v45, 0.0 }
 0x11a   : > { %v641_v22 = vadd.f32 %v2030_v20, %v2452_v42  ;;  %v632_v23 = vpop.f32.mrb[27].mxu0  ;;  %2104 = vmatmul.mubr.bf16.gmra.mrb[52].mxu1 %v863_v10  ;;  %v814_v33 = vmax.f32 %v638_v16, 0.0  ;;  %v879_v54 = vpack.c.bf16 %v843_v48, %v842_v39 }
 0x11b   : > { %v633_v28 = vadd.f32 %v2452_v42, %v632_v23  ;;  %v812_v37 = vmax.f32 %v630_v19, 0.0  ;;  %v878_v59 = vpack.c.bf16 %v841_v51, %v840_v44  ;;  %v2061_v61 = vpop.f32.mrb[24].mxu1 }
 0x11c   : > { %v815_v34 = vmax.f32 %v641_v22, 0.0  ;;  %v766_v0 = vadd.f32 %v2061_v61, %v2452_v42  ;;  %v757_v1 = vpop.f32.mrb[25].mxu1 }
 0x11d   : > { %v813_v38 = vmax.f32 %v633_v28, 0.0  ;;  %v758_v4 = vadd.f32 %v2452_v42, %v757_v1  ;;  %v2062_v5 = vpop.f32.mrb[26].mxu1 }
 0x11e   : > { %v865_v43 = vpack.c.bf16 %v815_v34, %v814_v33  ;;  %v846_v8 = vmax.f32 %v766_v0, 0.0  ;;  %v769_v9 = vadd.f32 %v2062_v5, %v2452_v42  ;;  %v760_v10 = vpop.f32.mrb[27].mxu1 }
 0x11f   : > { %v864_v46 = vpack.c.bf16 %v813_v38, %v812_v37  ;;  %v2033_v47 = vpop.f32.mrb[28].mxu0  ;;  %v844_v12 = vmax.f32 %v758_v4, 0.0  ;;  %v761_v13 = vadd.f32 %v2452_v42, %v760_v10 }
 0x120   : > { %v654_v49 = vadd.f32 %v2033_v47, %v2452_v42  ;;  %v645_v50 = vpop.f32.mrb[29].mxu0  ;;  %v847_v15 = vmax.f32 %v769_v9, 0.0 }
 0x121   : > { %v646_v52 = vadd.f32 %v2452_v42, %v645_v50  ;;  %v2034_v53 = vpop.f32.mrb[30].mxu0  ;;  %2107 = vmatprep.mubr.bf16.mxu1 %v864_v46  ;;  %v845_v16 = vmax.f32 %v761_v13, 0.0 }
 0x122   : > { %v657_v56 = vadd.f32 %v2034_v53, %v2452_v42  ;;  %v648_v57 = vpop.f32.mrb[31].mxu0  ;;  %2108 = vmatmul.mubr.bf16.gmra.mrb[56].mxu1 %v865_v43  ;;  %v818_v2 = vmax.f32 %v654_v49, 0.0  ;;  %v881_v17 = vpack.c.bf16 %v847_v15, %v846_v8 }
 0x123   : > { %v649_v62 = vadd.f32 %v2452_v42, %v648_v57  ;;  %v816_v6 = vmax.f32 %v646_v52, 0.0  ;;  %v880_v18 = vpack.c.bf16 %v845_v16, %v844_v12  ;;  %v2065_v19 = vpop.f32.mrb[28].mxu1 }
 0x124   : > { %v819_v3 = vmax.f32 %v657_v56, 0.0  ;;  %v782_v20 = vadd.f32 %v2065_v19, %v2452_v42  ;;  %v773_v22 = vpop.f32.mrb[29].mxu1 }
 0x125   : > { %v817_v7 = vmax.f32 %v649_v62, 0.0  ;;  %v774_v23 = vadd.f32 %v2452_v42, %v773_v22  ;;  %v2066_v26 = vpop.f32.mrb[30].mxu1 }
 0x126   : > { %v867_v11 = vpack.c.bf16 %v819_v3, %v818_v2  ;;  %v850_v28 = vmax.f32 %v782_v20, 0.0  ;;  %v785_v30 = vadd.f32 %v2066_v26, %v2452_v42  ;;  %v776_v31 = vpop.f32.mrb[31].mxu1 }
 0x127   : > { %v866_v14 = vpack.c.bf16 %v817_v7, %v816_v6  ;;  %v848_v33 = vmax.f32 %v774_v23, 0.0  ;;  %v777_v34 = vadd.f32 %v2452_v42, %v776_v31  ;;  %v2256_v42 = vld [vmem:[%s2853_s5 + $0x38] sm:$0xff]  }
 0x128   : > { %v851_v35 = vmax.f32 %v785_v30, 0.0  ;;  %2161 = vmatprep.subr.bf16.mxu0 %v2256_v42 }
 0x129   : > { %2111 = vmatprep.mubr.bf16.mxu1 %v866_v14  ;;  %v849_v36 = vmax.f32 %v777_v34, 0.0  ;;  %2162 = vmatpush3.bf16.msra.mxu0 %v2256_v42 }
 0x12a   : > { %2112 = vmatmul.mubr.bf16.gmra.mrb[60].mxu1 %v867_v11  ;;  %v883_v37 = vpack.c.bf16 %v851_v35, %v850_v28 }
 0x12b   : > { %2115 = vmatprep.mubr.bf16.mxu1 %v2486_v32  ;;  %v882_v38 = vpack.c.bf16 %v849_v36, %v848_v33 }
 0x132   : > { %2116 = vmatmul.mubr.bf16.gmra.mrb[64].mxu1 %v2483_v29  ;;  %v2575_v29 = vld [vmem:[%s2852_s4] ss:$0 sm:$0xff] }
 0x133   : > { %2119 = vmatprep.mubr.bf16.mxu1 %v2504_v63 }
 0x13a   : > { %2120 = vmatmul.mubr.bf16.gmra.mrb[68].mxu1 %v2501_v60 }
 0x13b   : > { %2123 = vmatprep.mubr.bf16.mxu1 %v2516_v27 }
 0x142   : > { %2124 = vmatmul.mubr.bf16.gmra.mrb[72].mxu1 %v2513_v24 }
 0x143   : > { %2127 = vmatprep.mubr.bf16.mxu1 %v2528_v58 }
 0x14a   : > { %2128 = vmatmul.mubr.bf16.gmra.mrb[76].mxu1 %v2525_v55 }
 0x14b   : > { %2131 = vmatprep.mubr.bf16.mxu1 %v2540_v25 }
 0x152   : > { %2132 = vmatmul.mubr.bf16.gmra.mrb[80].mxu1 %v2537_v21 }
 0x153   : > { %2135 = vmatprep.mubr.bf16.mxu1 %v878_v59 }
 0x15a   : > { %2136 = vmatmul.mubr.bf16.gmra.mrb[84].mxu1 %v879_v54 }
 0x15b   : > { %2139 = vmatprep.mubr.bf16.mxu1 %v880_v18 }
 0x162   : > { %2140 = vmatmul.mubr.bf16.gmra.mrb[88].mxu1 %v881_v17 }
 0x163   : > { %2143 = vmatprep.mubr.bf16.mxu1 %v882_v38 }
 0x16a   : > { %2144 = vmatmul.mubr.bf16.gmra.mrb[92].mxu1 %v883_v37 }
 0x1c5   : > { %v2085_v32 = vpop.f32.mrb[32].mxu1 }
 0x1c6   : > { %v998_v60 = vadd.f32 %v2085_v32, %v2575_v29  ;;  %v989_v63 = vpop.f32.mrb[33].mxu1 }
 0x1c7   : > { %v990_v24 = vadd.f32 %v2575_v29, %v989_v63  ;;  %v2086_v27 = vpop.f32.mrb[34].mxu1 }
 0x1c8   : > { %v1001_v55 = vadd.f32 %v2086_v27, %v2575_v29  ;;  %v992_v58 = vpop.f32.mrb[35].mxu1  ;;  %v1246_v25 = vmax.f32 %v998_v60, 0.0 }
 0x1c9   : > { %v993_v21 = vadd.f32 %v2575_v29, %v992_v58  ;;  %v1244_v40 = vmax.f32 %v990_v24, 0.0 }
 0x1ca   : > { %v1247_v39 = vmax.f32 %v1001_v55, 0.0 }
 0x1cb   : > { %v1245_v41 = vmax.f32 %v993_v21, 0.0 }
 0x1cc   : > { %v1309_v43 = vpack.c.bf16 %v1247_v39, %v1246_v25 }
 0x1cd   : > { %v1308_v44 = vpack.c.bf16 %v1245_v41, %v1244_v40  ;;  %v2089_v45 = vpop.f32.mrb[36].mxu1 }
 0x1ce   : > { %v1014_v46 = vadd.f32 %v2089_v45, %v2575_v29  ;;  %v1005_v47 = vpop.f32.mrb[37].mxu1 }
 0x1cf   : > { %v1006_v48 = vadd.f32 %v2575_v29, %v1005_v47  ;;  %v2090_v49 = vpop.f32.mrb[38].mxu1  ;;  %2163 = vmatprep.mubr.bf16.mxu0 %v1308_v44 }
 0x1d0   : > { %v1017_v50 = vadd.f32 %v2090_v49, %v2575_v29  ;;  %v1008_v51 = vpop.f32.mrb[39].mxu1  ;;  %2164 = vmatmul.mubr.bf16.vlgmr.msra.gmra.mrb[32].mxu0 %v1309_v43  ;;  %v1250_v53 = vmax.f32 %v1014_v46, 0.0 }
 0x1d1   : > { %v1009_v52 = vadd.f32 %v2575_v29, %v1008_v51  ;;  %v1248_v56 = vmax.f32 %v1006_v48, 0.0 }
 0x1d2   : > { %v1251_v54 = vmax.f32 %v1017_v50, 0.0 }
 0x1d3   : > { %v1249_v57 = vmax.f32 %v1009_v52, 0.0 }
 0x1d4   : > { %v1311_v59 = vpack.c.bf16 %v1251_v54, %v1250_v53 }
 0x1d5   : > { %v1310_v61 = vpack.c.bf16 %v1249_v57, %v1248_v56  ;;  %v2093_v62 = vpop.f32.mrb[40].mxu1 }
 0x1d6   : > { %v1030_v0 = vadd.f32 %v2093_v62, %v2575_v29  ;;  %v1021_v1 = vpop.f32.mrb[41].mxu1 }
 0x1d7   : > { %v1022_v2 = vadd.f32 %v2575_v29, %v1021_v1  ;;  %v2094_v3 = vpop.f32.mrb[42].mxu1  ;;  %2167 = vmatprep.mubr.bf16.mxu0 %v1310_v61 }
 0x1d8   : > { %v1033_v4 = vadd.f32 %v2094_v3, %v2575_v29  ;;  %v1024_v5 = vpop.f32.mrb[43].mxu1  ;;  %2168 = vmatmul.mubr.bf16.gmra.mrb[36].mxu0 %v1311_v59  ;;  %v1254_v7 = vmax.f32 %v1030_v0, 0.0 }
 0x1d9   : > { %v1025_v6 = vadd.f32 %v2575_v29, %v1024_v5  ;;  %v1252_v9 = vmax.f32 %v1022_v2, 0.0 }
 0x1da   : > { %v1255_v8 = vmax.f32 %v1033_v4, 0.0 }
 0x1db   : > { %v1253_v10 = vmax.f32 %v1025_v6, 0.0 }
 0x1dc   : > { %v1313_v11 = vpack.c.bf16 %v1255_v8, %v1254_v7 }
 0x1dd   : > { %v1312_v12 = vpack.c.bf16 %v1253_v10, %v1252_v9  ;;  %v2097_v13 = vpop.f32.mrb[44].mxu1 }
 0x1de   : > { %v1046_v14 = vadd.f32 %v2097_v13, %v2575_v29  ;;  %v1037_v15 = vpop.f32.mrb[45].mxu1 }
 0x1df   : > { %v1038_v16 = vadd.f32 %v2575_v29, %v1037_v15  ;;  %v2098_v17 = vpop.f32.mrb[46].mxu1  ;;  %2171 = vmatprep.mubr.bf16.mxu0 %v1312_v12 }
 0x1e0   : > { %v1049_v18 = vadd.f32 %v2098_v17, %v2575_v29  ;;  %v1040_v19 = vpop.f32.mrb[47].mxu1  ;;  %2172 = vmatmul.mubr.bf16.gmra.mrb[40].mxu0 %v1313_v11  ;;  %v1258_v22 = vmax.f32 %v1046_v14, 0.0 }
 0x1e1   : > { %v1041_v20 = vadd.f32 %v2575_v29, %v1040_v19  ;;  %v1256_v26 = vmax.f32 %v1038_v16, 0.0 }
 0x1e2   : > { %v1259_v23 = vmax.f32 %v1049_v18, 0.0 }
 0x1e3   : > { %v1257_v28 = vmax.f32 %v1041_v20, 0.0 }
 0x1e4   : > { %v1315_v30 = vpack.c.bf16 %v1259_v23, %v1258_v22 }
 0x1e5   : > { %v1314_v31 = vpack.c.bf16 %v1257_v28, %v1256_v26  ;;  %v2101_v33 = vpop.f32.mrb[48].mxu1 }
 0x1e6   : > { %v1062_v34 = vadd.f32 %v2101_v33, %v2575_v29  ;;  %v1053_v35 = vpop.f32.mrb[49].mxu1 }
 0x1e7   : > { %v1054_v36 = vadd.f32 %v2575_v29, %v1053_v35  ;;  %v2102_v37 = vpop.f32.mrb[50].mxu1  ;;  %2175 = vmatprep.mubr.bf16.mxu0 %v1314_v31 }
 0x1e8   : > { %v1065_v38 = vadd.f32 %v2102_v37, %v2575_v29  ;;  %v1056_v42 = vpop.f32.mrb[51].mxu1  ;;  %2176 = vmatmul.mubr.bf16.gmra.mrb[44].mxu0 %v1315_v30  ;;  %v1262_v60 = vmax.f32 %v1062_v34, 0.0 }
 0x1e9   : > { %v1057_v32 = vadd.f32 %v2575_v29, %v1056_v42  ;;  %v1260_v24 = vmax.f32 %v1054_v36, 0.0 }
 0x1ea   : > { %v1263_v63 = vmax.f32 %v1065_v38, 0.0 }
 0x1eb   : > { %v1261_v27 = vmax.f32 %v1057_v32, 0.0 }
 0x1ec   : > { %v1317_v55 = vpack.c.bf16 %v1263_v63, %v1262_v60 }
 0x1ed   : > { %v1316_v58 = vpack.c.bf16 %v1261_v27, %v1260_v24  ;;  %v2105_v21 = vpop.f32.mrb[52].mxu1 }
 0x1ee   : > { %v1078_v25 = vadd.f32 %v2105_v21, %v2575_v29  ;;  %v1069_v39 = vpop.f32.mrb[53].mxu1 }
 0x1ef   : > { %v1070_v40 = vadd.f32 %v2575_v29, %v1069_v39  ;;  %v2106_v41 = vpop.f32.mrb[54].mxu1  ;;  %2179 = vmatprep.mubr.bf16.mxu0 %v1316_v58 }
 0x1f0   : > { %v1081_v43 = vadd.f32 %v2106_v41, %v2575_v29  ;;  %v1072_v44 = vpop.f32.mrb[55].mxu1  ;;  %2180 = vmatmul.mubr.bf16.gmra.mrb[48].mxu0 %v1317_v55  ;;  %v1266_v46 = vmax.f32 %v1078_v25, 0.0 }
 0x1f1   : > { %v1073_v45 = vadd.f32 %v2575_v29, %v1072_v44  ;;  %v1264_v48 = vmax.f32 %v1070_v40, 0.0 }
 0x1f2   : > { %v1267_v47 = vmax.f32 %v1081_v43, 0.0 }
 0x1f3   : > { %v1265_v49 = vmax.f32 %v1073_v45, 0.0 }
 0x1f4   : > { %v1319_v50 = vpack.c.bf16 %v1267_v47, %v1266_v46 }
 0x1f5   : > { %v1318_v51 = vpack.c.bf16 %v1265_v49, %v1264_v48  ;;  %v2109_v52 = vpop.f32.mrb[56].mxu1 }
 0x1f6   : > { %v1094_v53 = vadd.f32 %v2109_v52, %v2575_v29  ;;  %v1085_v54 = vpop.f32.mrb[57].mxu1 }
 0x1f7   : > { %v1086_v56 = vadd.f32 %v2575_v29, %v1085_v54  ;;  %v2110_v57 = vpop.f32.mrb[58].mxu1  ;;  %2183 = vmatprep.mubr.bf16.mxu0 %v1318_v51 }
 0x1f8   : > { %v1097_v59 = vadd.f32 %v2110_v57, %v2575_v29  ;;  %v1088_v61 = vpop.f32.mrb[59].mxu1  ;;  %2184 = vmatmul.mubr.bf16.gmra.mrb[52].mxu0 %v1319_v50  ;;  %v1270_v0 = vmax.f32 %v1094_v53, 0.0 }
 0x1f9   : > { %v1089_v62 = vadd.f32 %v2575_v29, %v1088_v61  ;;  %v1268_v2 = vmax.f32 %v1086_v56, 0.0 }
 0x1fa   : > { %v1271_v1 = vmax.f32 %v1097_v59, 0.0 }
 0x1fb   : > { %v1269_v3 = vmax.f32 %v1089_v62, 0.0 }
 0x1fc   : > { %v1321_v4 = vpack.c.bf16 %v1271_v1, %v1270_v0 }
 0x1fd   : > { %v1320_v5 = vpack.c.bf16 %v1269_v3, %v1268_v2  ;;  %v2113_v6 = vpop.f32.mrb[60].mxu1 }
 0x1fe   : > { %v1110_v7 = vadd.f32 %v2113_v6, %v2575_v29  ;;  %v1101_v8 = vpop.f32.mrb[61].mxu1 }
 0x1ff   : > { %v1102_v9 = vadd.f32 %v2575_v29, %v1101_v8  ;;  %v2114_v10 = vpop.f32.mrb[62].mxu1  ;;  %2187 = vmatprep.mubr.bf16.mxu0 %v1320_v5 }
 0x200   : > { %v1113_v11 = vadd.f32 %v2114_v10, %v2575_v29  ;;  %v1104_v12 = vpop.f32.mrb[63].mxu1  ;;  %2188 = vmatmul.mubr.bf16.gmra.mrb[56].mxu0 %v1321_v4  ;;  %v1274_v14 = vmax.f32 %v1110_v7, 0.0 }
 0x201   : > { %v1105_v13 = vadd.f32 %v2575_v29, %v1104_v12  ;;  %v1272_v16 = vmax.f32 %v1102_v9, 0.0 }
 0x202   : > { %v1275_v15 = vmax.f32 %v1113_v11, 0.0 }
 0x203   : > { %v1273_v17 = vmax.f32 %v1105_v13, 0.0 }
 0x204   : > { %v1323_v18 = vpack.c.bf16 %v1275_v15, %v1274_v14 }
 0x205   : > { %v1322_v19 = vpack.c.bf16 %v1273_v17, %v1272_v16  ;;  %v2117_v20 = vpop.f32.mrb[64].mxu1 }
 0x206   : > { %v1126_v22 = vadd.f32 %v2117_v20, %v2575_v29  ;;  %v1117_v23 = vpop.f32.mrb[65].mxu1 }
 0x207   : > { %v1118_v26 = vadd.f32 %v2575_v29, %v1117_v23  ;;  %v2118_v28 = vpop.f32.mrb[66].mxu1  ;;  %2191 = vmatprep.mubr.bf16.mxu0 %v1322_v19 }
 0x208   : > { %v1129_v30 = vadd.f32 %v2118_v28, %v2575_v29  ;;  %v1120_v31 = vpop.f32.mrb[67].mxu1  ;;  %2192 = vmatmul.mubr.bf16.gmra.mrb[60].mxu0 %v1323_v18  ;;  %v1278_v34 = vmax.f32 %v1126_v22, 0.0 }
 0x209   : > { %v1121_v33 = vadd.f32 %v2575_v29, %v1120_v31  ;;  %v1276_v36 = vmax.f32 %v1118_v26, 0.0 }
 0x20a   : > { %v1279_v35 = vmax.f32 %v1129_v30, 0.0 }
 0x20b   : > { %v1277_v37 = vmax.f32 %v1121_v33, 0.0 }
 0x20c   : > { %v1325_v38 = vpack.c.bf16 %v1279_v35, %v1278_v34 }
 0x20d   : > { %v1324_v42 = vpack.c.bf16 %v1277_v37, %v1276_v36  ;;  %v2121_v32 = vpop.f32.mrb[68].mxu1 }
 0x20e   : > { %v1142_v60 = vadd.f32 %v2121_v32, %v2575_v29  ;;  %v1133_v63 = vpop.f32.mrb[69].mxu1 }
 0x20f   : > { %v1134_v24 = vadd.f32 %v2575_v29, %v1133_v63  ;;  %v2122_v27 = vpop.f32.mrb[70].mxu1  ;;  %2195 = vmatprep.mubr.bf16.mxu0 %v1324_v42 }
 0x210   : > { %v1145_v55 = vadd.f32 %v2122_v27, %v2575_v29  ;;  %v1136_v58 = vpop.f32.mrb[71].mxu1  ;;  %2196 = vmatmul.mubr.bf16.gmra.mrb[64].mxu0 %v1325_v38  ;;  %v1282_v25 = vmax.f32 %v1142_v60, 0.0 }
 0x211   : > { %v1137_v21 = vadd.f32 %v2575_v29, %v1136_v58  ;;  %v1280_v40 = vmax.f32 %v1134_v24, 0.0 }
 0x212   : > { %v1283_v39 = vmax.f32 %v1145_v55, 0.0 }
 0x213   : > { %v1281_v41 = vmax.f32 %v1137_v21, 0.0 }
 0x214   : > { %v1327_v43 = vpack.c.bf16 %v1283_v39, %v1282_v25 }
 0x215   : > { %v1326_v44 = vpack.c.bf16 %v1281_v41, %v1280_v40  ;;  %v2125_v45 = vpop.f32.mrb[72].mxu1 }
 0x216   : > { %v1158_v46 = vadd.f32 %v2125_v45, %v2575_v29  ;;  %v1149_v47 = vpop.f32.mrb[73].mxu1 }
 0x217   : > { %v1150_v48 = vadd.f32 %v2575_v29, %v1149_v47  ;;  %v2126_v49 = vpop.f32.mrb[74].mxu1  ;;  %2199 = vmatprep.mubr.bf16.mxu0 %v1326_v44 }
 0x218   : > { %v1161_v50 = vadd.f32 %v2126_v49, %v2575_v29  ;;  %v1152_v51 = vpop.f32.mrb[75].mxu1  ;;  %2200 = vmatmul.mubr.bf16.gmra.mrb[68].mxu0 %v1327_v43  ;;  %v1286_v53 = vmax.f32 %v1158_v46, 0.0 }
 0x219   : > { %v1153_v52 = vadd.f32 %v2575_v29, %v1152_v51  ;;  %v1284_v56 = vmax.f32 %v1150_v48, 0.0 }
 0x21a   : > { %v1287_v54 = vmax.f32 %v1161_v50, 0.0 }
 0x21b   : > { %v1285_v57 = vmax.f32 %v1153_v52, 0.0 }
 0x21c   : > { %v1329_v59 = vpack.c.bf16 %v1287_v54, %v1286_v53 }
 0x21d   : > { %v1328_v61 = vpack.c.bf16 %v1285_v57, %v1284_v56  ;;  %v2129_v62 = vpop.f32.mrb[76].mxu1 }
 0x21e   : > { %v1174_v0 = vadd.f32 %v2129_v62, %v2575_v29  ;;  %v1165_v1 = vpop.f32.mrb[77].mxu1 }
 0x21f   : > { %v1166_v2 = vadd.f32 %v2575_v29, %v1165_v1  ;;  %v2130_v3 = vpop.f32.mrb[78].mxu1  ;;  %2203 = vmatprep.mubr.bf16.mxu0 %v1328_v61 }
 0x220   : > { %v1177_v4 = vadd.f32 %v2130_v3, %v2575_v29  ;;  %v1168_v5 = vpop.f32.mrb[79].mxu1  ;;  %2204 = vmatmul.mubr.bf16.gmra.mrb[72].mxu0 %v1329_v59  ;;  %v1290_v7 = vmax.f32 %v1174_v0, 0.0 }
 0x221   : > { %v1169_v6 = vadd.f32 %v2575_v29, %v1168_v5  ;;  %v1288_v9 = vmax.f32 %v1166_v2, 0.0 }
 0x222   : > { %v1291_v8 = vmax.f32 %v1177_v4, 0.0 }
 0x223   : > { %v1289_v10 = vmax.f32 %v1169_v6, 0.0  ;;  %v2644_v6 = vld [vmem:[%s2854_s6] ss:$0 sm:$0xff] }
 0x224   : > { %v1331_v11 = vpack.c.bf16 %v1291_v8, %v1290_v7 }
 0x225   : > { %v1330_v12 = vpack.c.bf16 %v1289_v10, %v1288_v9  ;;  %v2133_v13 = vpop.f32.mrb[80].mxu1 }
 0x226   : > { %v1190_v14 = vadd.f32 %v2133_v13, %v2575_v29  ;;  %v1181_v15 = vpop.f32.mrb[81].mxu1 }
 0x227   : > { %v1182_v16 = vadd.f32 %v2575_v29, %v1181_v15  ;;  %v2134_v17 = vpop.f32.mrb[82].mxu1  ;;  %2207 = vmatprep.mubr.bf16.mxu0 %v1330_v12 }
 0x228   : > { %v1193_v18 = vadd.f32 %v2134_v17, %v2575_v29  ;;  %v1184_v19 = vpop.f32.mrb[83].mxu1  ;;  %2208 = vmatmul.mubr.bf16.gmra.mrb[76].mxu0 %v1331_v11  ;;  %v1294_v22 = vmax.f32 %v1190_v14, 0.0 }
 0x229   : > { %v1185_v20 = vadd.f32 %v2575_v29, %v1184_v19  ;;  %v1292_v26 = vmax.f32 %v1182_v16, 0.0 }
 0x22a   : > { %v1295_v23 = vmax.f32 %v1193_v18, 0.0 }
 0x22b   : > { %v1293_v28 = vmax.f32 %v1185_v20, 0.0 }
 0x22c   : > { %v1333_v30 = vpack.c.bf16 %v1295_v23, %v1294_v22 }
 0x22d   : > { %v1332_v31 = vpack.c.bf16 %v1293_v28, %v1292_v26  ;;  %v2137_v33 = vpop.f32.mrb[84].mxu1 }
 0x22e   : > { %v1206_v34 = vadd.f32 %v2137_v33, %v2575_v29  ;;  %v1197_v35 = vpop.f32.mrb[85].mxu1 }
 0x22f   : > { %v1198_v36 = vadd.f32 %v2575_v29, %v1197_v35  ;;  %v2138_v37 = vpop.f32.mrb[86].mxu1  ;;  %2211 = vmatprep.mubr.bf16.mxu0 %v1332_v31 }
 0x230   : > { %v1209_v38 = vadd.f32 %v2138_v37, %v2575_v29  ;;  %v1200_v42 = vpop.f32.mrb[87].mxu1  ;;  %2212 = vmatmul.mubr.bf16.gmra.mrb[80].mxu0 %v1333_v30  ;;  %v1298_v60 = vmax.f32 %v1206_v34, 0.0 }
 0x231   : > { %v1201_v32 = vadd.f32 %v2575_v29, %v1200_v42  ;;  %v1296_v24 = vmax.f32 %v1198_v36, 0.0 }
 0x232   : > { %v1299_v63 = vmax.f32 %v1209_v38, 0.0 }
 0x233   : > { %v1297_v27 = vmax.f32 %v1201_v32, 0.0 }
 0x234   : > { %v1335_v55 = vpack.c.bf16 %v1299_v63, %v1298_v60 }
 0x235   : > { %v1334_v58 = vpack.c.bf16 %v1297_v27, %v1296_v24  ;;  %v2141_v21 = vpop.f32.mrb[88].mxu1 }
 0x236   : > { %v1222_v25 = vadd.f32 %v2141_v21, %v2575_v29  ;;  %v1213_v39 = vpop.f32.mrb[89].mxu1 }
 0x237   : > { %v1214_v40 = vadd.f32 %v2575_v29, %v1213_v39  ;;  %v2142_v41 = vpop.f32.mrb[90].mxu1  ;;  %2215 = vmatprep.mubr.bf16.mxu0 %v1334_v58 }
 0x238   : > { %v1225_v43 = vadd.f32 %v2142_v41, %v2575_v29  ;;  %v1216_v44 = vpop.f32.mrb[91].mxu1  ;;  %2216 = vmatmul.mubr.bf16.gmra.mrb[84].mxu0 %v1335_v55  ;;  %v1302_v46 = vmax.f32 %v1222_v25, 0.0 }
 0x239   : > { %v1217_v45 = vadd.f32 %v2575_v29, %v1216_v44  ;;  %v1300_v48 = vmax.f32 %v1214_v40, 0.0 }
 0x23a   : > { %v1303_v47 = vmax.f32 %v1225_v43, 0.0 }
 0x23b   : > { %v1301_v49 = vmax.f32 %v1217_v45, 0.0 }
 0x23c   : > { %v1337_v50 = vpack.c.bf16 %v1303_v47, %v1302_v46 }
 0x23d   : > { %v1336_v51 = vpack.c.bf16 %v1301_v49, %v1300_v48  ;;  %v2145_v52 = vpop.f32.mrb[92].mxu1 }
 0x23e   : > { %v1238_v53 = vadd.f32 %v2145_v52, %v2575_v29  ;;  %v1229_v54 = vpop.f32.mrb[93].mxu1 }
 0x23f   : > { %v1230_v56 = vadd.f32 %v2575_v29, %v1229_v54  ;;  %v2146_v57 = vpop.f32.mrb[94].mxu1  ;;  %2219 = vmatprep.mubr.bf16.mxu0 %v1336_v51 }
 0x240   : > { %v1241_v59 = vadd.f32 %v2146_v57, %v2575_v29  ;;  %v1232_v61 = vpop.f32.mrb[95].mxu1  ;;  %2220 = vmatmul.mubr.bf16.gmra.mrb[88].mxu0 %v1337_v50  ;;  %v1306_v0 = vmax.f32 %v1238_v53, 0.0 }
 0x241   : > { %v1233_v62 = vadd.f32 %v2575_v29, %v1232_v61  ;;  %v1304_v2 = vmax.f32 %v1230_v56, 0.0 }
 0x242   : > { %v1307_v1 = vmax.f32 %v1241_v59, 0.0 }
 0x243   : > { %v1305_v3 = vmax.f32 %v1233_v62, 0.0 }
 0x244   : > { %v1339_v4 = vpack.c.bf16 %v1307_v1, %v1306_v0 }
 0x245   : > { %v1338_v5 = vpack.c.bf16 %v1305_v3, %v1304_v2 }
 0x247   : > { %2223 = vmatprep.mubr.bf16.mxu0 %v1338_v5 }
 0x248   : > { %2224 = vmatmul.mubr.bf16.gmra.mrb[92].mxu0 %v1339_v4 }
 0x2a3   : > { %v2165_v29 = vpop.f32.mrb[32].mxu0 }
 0x2a4   : > { %v1454_v7 = vadd.f32 %v2165_v29, %v2644_v6  ;;  %v1445_v8 = vpop.f32.mrb[33].mxu0 }
 0x2a5   : > { %v1446_v9 = vadd.f32 %v2644_v6, %v1445_v8  ;;  %v2166_v10 = vpop.f32.mrb[34].mxu0 }
 0x2a6   : > { %1703 = vst.msk [vmem:[%s2651_s12 + $0x10] sm:$0xff] %vm1700_vm1, %v1454_v7  ;;  %v1457_v11 = vadd.f32 %v2166_v10, %v2644_v6  ;;  %v1448_v12 = vpop.f32.mrb[35].mxu0 }
 0x2a7   : > { %1701 = vst.msk [vmem:[%s2651_s12] sm:$0xff] %vm1700_vm1, %v1446_v9  ;;  %v1449_v13 = vadd.f32 %v2644_v6, %v1448_v12 }
 0x2a8   : > { %1704 = vst.msk [vmem:[%s2651_s12 + $0x18] sm:$0xff] %vm1700_vm1, %v1457_v11 }
 0x2a9   : > { %1702 = vst.msk [vmem:[%s2651_s12 + $0x8] sm:$0xff] %vm1700_vm1, %v1449_v13 }
 0x2ab   : > { %v2169_v14 = vpop.f32.mrb[36].mxu0 }
 0x2ac   : > { %v1470_v15 = vadd.f32 %v2169_v14, %v2644_v6  ;;  %v1461_v16 = vpop.f32.mrb[37].mxu0 }
 0x2ad   : > { %v1462_v17 = vadd.f32 %v2644_v6, %v1461_v16  ;;  %v2170_v18 = vpop.f32.mrb[38].mxu0 }
 0x2ae   : > { %1707 = vst.msk [vmem:[%s2651_s12 + $0x30] sm:$0xff] %vm1700_vm1, %v1470_v15  ;;  %v1473_v19 = vadd.f32 %v2170_v18, %v2644_v6  ;;  %v1464_v20 = vpop.f32.mrb[39].mxu0 }
 0x2af   : > { %1705 = vst.msk [vmem:[%s2651_s12 + $0x20] sm:$0xff] %vm1700_vm1, %v1462_v17  ;;  %v1465_v22 = vadd.f32 %v2644_v6, %v1464_v20 }
 0x2b0   : > { %1708 = vst.msk [vmem:[%s2651_s12 + $0x38] sm:$0xff] %vm1700_vm1, %v1473_v19 }
 0x2b1   : > { %1706 = vst.msk [vmem:[%s2651_s12 + $0x28] sm:$0xff] %vm1700_vm1, %v1465_v22 }
 0x2b3   : > { %v2173_v23 = vpop.f32.mrb[40].mxu0 }
 0x2b4   : > { %v1486_v26 = vadd.f32 %v2173_v23, %v2644_v6  ;;  %v1477_v28 = vpop.f32.mrb[41].mxu0 }
 0x2b5   : > { %v1478_v30 = vadd.f32 %v2644_v6, %v1477_v28  ;;  %v2174_v31 = vpop.f32.mrb[42].mxu0 }
 0x2b6   : > { %1711 = vst.msk [vmem:[%s2651_s12 + $0x50] sm:$0xff] %vm1700_vm1, %v1486_v26  ;;  %v1489_v33 = vadd.f32 %v2174_v31, %v2644_v6  ;;  %v1480_v34 = vpop.f32.mrb[43].mxu0 }
 0x2b7   : > { %1709 = vst.msk [vmem:[%s2651_s12 + $0x40] sm:$0xff] %vm1700_vm1, %v1478_v30  ;;  %v1481_v35 = vadd.f32 %v2644_v6, %v1480_v34 }
 0x2b8   : > { %1712 = vst.msk [vmem:[%s2651_s12 + $0x58] sm:$0xff] %vm1700_vm1, %v1489_v33 }
 0x2b9   : > { %1710 = vst.msk [vmem:[%s2651_s12 + $0x48] sm:$0xff] %vm1700_vm1, %v1481_v35 }
 0x2bb   : > { %v2177_v36 = vpop.f32.mrb[44].mxu0 }
 0x2bc   : > { %v1502_v37 = vadd.f32 %v2177_v36, %v2644_v6  ;;  %v1493_v38 = vpop.f32.mrb[45].mxu0 }
 0x2bd   : > { %v1494_v42 = vadd.f32 %v2644_v6, %v1493_v38  ;;  %v2178_v32 = vpop.f32.mrb[46].mxu0 }
 0x2be   : > { %1715 = vst.msk [vmem:[%s2651_s12 + $0x70] sm:$0xff] %vm1700_vm1, %v1502_v37  ;;  %v1505_v60 = vadd.f32 %v2178_v32, %v2644_v6  ;;  %v1496_v63 = vpop.f32.mrb[47].mxu0 }
 0x2bf   : > { %1713 = vst.msk [vmem:[%s2651_s12 + $0x60] sm:$0xff] %vm1700_vm1, %v1494_v42  ;;  %v1497_v24 = vadd.f32 %v2644_v6, %v1496_v63 }
 0x2c0   : > { %1716 = vst.msk [vmem:[%s2651_s12 + $0x78] sm:$0xff] %vm1700_vm1, %v1505_v60 }
 0x2c1   : > { %1714 = vst.msk [vmem:[%s2651_s12 + $0x68] sm:$0xff] %vm1700_vm1, %v1497_v24 }
 0x2c3   : > { %v2181_v27 = vpop.f32.mrb[48].mxu0 }
 0x2c4   : > { %v1518_v55 = vadd.f32 %v2181_v27, %v2644_v6  ;;  %v1509_v58 = vpop.f32.mrb[49].mxu0 }
 0x2c5   : > { %v1510_v21 = vadd.f32 %v2644_v6, %v1509_v58  ;;  %v2182_v25 = vpop.f32.mrb[50].mxu0 }
 0x2c6   : > { %1719 = vst.msk [vmem:[%s2651_s12 + $0x90] sm:$0xff] %vm1700_vm1, %v1518_v55  ;;  %v1521_v39 = vadd.f32 %v2182_v25, %v2644_v6  ;;  %v1512_v40 = vpop.f32.mrb[51].mxu0 }
 0x2c7   : > { %1717 = vst.msk [vmem:[%s2651_s12 + $0x80] sm:$0xff] %vm1700_vm1, %v1510_v21  ;;  %v1513_v41 = vadd.f32 %v2644_v6, %v1512_v40 }
 0x2c8   : > { %1720 = vst.msk [vmem:[%s2651_s12 + $0x98] sm:$0xff] %vm1700_vm1, %v1521_v39 }
 0x2c9   : > { %1718 = vst.msk [vmem:[%s2651_s12 + $0x88] sm:$0xff] %vm1700_vm1, %v1513_v41 }
 0x2cb   : > { %v2185_v43 = vpop.f32.mrb[52].mxu0 }
 0x2cc   : > { %v1534_v44 = vadd.f32 %v2185_v43, %v2644_v6  ;;  %v1525_v45 = vpop.f32.mrb[53].mxu0 }
 0x2cd   : > { %v1526_v46 = vadd.f32 %v2644_v6, %v1525_v45  ;;  %v2186_v47 = vpop.f32.mrb[54].mxu0 }
 0x2ce   : > { %1723 = vst.msk [vmem:[%s2651_s12 + $0xb0] sm:$0xff] %vm1700_vm1, %v1534_v44  ;;  %v1537_v48 = vadd.f32 %v2186_v47, %v2644_v6  ;;  %v1528_v49 = vpop.f32.mrb[55].mxu0 }
 0x2cf   : > { %1721 = vst.msk [vmem:[%s2651_s12 + $0xa0] sm:$0xff] %vm1700_vm1, %v1526_v46  ;;  %v1529_v50 = vadd.f32 %v2644_v6, %v1528_v49 }
 0x2d0   : > { %1724 = vst.msk [vmem:[%s2651_s12 + $0xb8] sm:$0xff] %vm1700_vm1, %v1537_v48 }
 0x2d1   : > { %1722 = vst.msk [vmem:[%s2651_s12 + $0xa8] sm:$0xff] %vm1700_vm1, %v1529_v50 }
 0x2d3   : > { %v2189_v51 = vpop.f32.mrb[56].mxu0 }
 0x2d4   : > { %v1550_v52 = vadd.f32 %v2189_v51, %v2644_v6  ;;  %v1541_v53 = vpop.f32.mrb[57].mxu0 }
 0x2d5   : > { %v1542_v54 = vadd.f32 %v2644_v6, %v1541_v53  ;;  %v2190_v56 = vpop.f32.mrb[58].mxu0 }
 0x2d6   : > { %1727 = vst.msk [vmem:[%s2651_s12 + $0xd0] sm:$0xff] %vm1700_vm1, %v1550_v52  ;;  %v1553_v57 = vadd.f32 %v2190_v56, %v2644_v6  ;;  %v1544_v59 = vpop.f32.mrb[59].mxu0 }
 0x2d7   : > { %1725 = vst.msk [vmem:[%s2651_s12 + $0xc0] sm:$0xff] %vm1700_vm1, %v1542_v54  ;;  %v1545_v61 = vadd.f32 %v2644_v6, %v1544_v59 }
 0x2d8   : > { %1728 = vst.msk [vmem:[%s2651_s12 + $0xd8] sm:$0xff] %vm1700_vm1, %v1553_v57 }
 0x2d9   : > { %1726 = vst.msk [vmem:[%s2651_s12 + $0xc8] sm:$0xff] %vm1700_vm1, %v1545_v61 }
 0x2db   : > { %v2193_v62 = vpop.f32.mrb[60].mxu0 }
 0x2dc   : > { %v1566_v0 = vadd.f32 %v2193_v62, %v2644_v6  ;;  %v1557_v1 = vpop.f32.mrb[61].mxu0 }
 0x2dd   : > { %v1558_v2 = vadd.f32 %v2644_v6, %v1557_v1  ;;  %v2194_v3 = vpop.f32.mrb[62].mxu0 }
 0x2de   : > { %1731 = vst.msk [vmem:[%s2651_s12 + $0xf0] sm:$0xff] %vm1700_vm1, %v1566_v0  ;;  %v1569_v4 = vadd.f32 %v2194_v3, %v2644_v6  ;;  %v1560_v5 = vpop.f32.mrb[63].mxu0 }
 0x2df   : > { %1729 = vst.msk [vmem:[%s2651_s12 + $0xe0] sm:$0xff] %vm1700_vm1, %v1558_v2  ;;  %v1561_v29 = vadd.f32 %v2644_v6, %v1560_v5 }
 0x2e0   : > { %1732 = vst.msk [vmem:[%s2651_s12 + $0xf8] sm:$0xff] %vm1700_vm1, %v1569_v4 }
 0x2e1   : > { %1730 = vst.msk [vmem:[%s2651_s12 + $0xe8] sm:$0xff] %vm1700_vm1, %v1561_v29 }
 0x2e3   : > { %v2197_v7 = vpop.f32.mrb[64].mxu0 }
 0x2e4   : > { %v1582_v8 = vadd.f32 %v2197_v7, %v2644_v6  ;;  %v1573_v9 = vpop.f32.mrb[65].mxu0 }
 0x2e5   : > { %v1574_v10 = vadd.f32 %v2644_v6, %v1573_v9  ;;  %v2198_v11 = vpop.f32.mrb[66].mxu0 }
 0x2e6   : > { %1735 = vst.msk [vmem:[%s2651_s12 + $0x110] sm:$0xff] %vm1700_vm1, %v1582_v8  ;;  %v1585_v12 = vadd.f32 %v2198_v11, %v2644_v6  ;;  %v1576_v13 = vpop.f32.mrb[67].mxu0 }
 0x2e7   : > { %1733 = vst.msk [vmem:[%s2651_s12 + $0x100] sm:$0xff] %vm1700_vm1, %v1574_v10  ;;  %v1577_v14 = vadd.f32 %v2644_v6, %v1576_v13 }
 0x2e8   : > { %1736 = vst.msk [vmem:[%s2651_s12 + $0x118] sm:$0xff] %vm1700_vm1, %v1585_v12 }
 0x2e9   : > { %1734 = vst.msk [vmem:[%s2651_s12 + $0x108] sm:$0xff] %vm1700_vm1, %v1577_v14 }
 0x2eb   : > { %v2201_v15 = vpop.f32.mrb[68].mxu0 }
 0x2ec   : > { %v1598_v16 = vadd.f32 %v2201_v15, %v2644_v6  ;;  %v1589_v17 = vpop.f32.mrb[69].mxu0 }
 0x2ed   : > { %v1590_v18 = vadd.f32 %v2644_v6, %v1589_v17  ;;  %v2202_v19 = vpop.f32.mrb[70].mxu0 }
 0x2ee   : > { %1739 = vst.msk [vmem:[%s2651_s12 + $0x130] sm:$0xff] %vm1700_vm1, %v1598_v16  ;;  %v1601_v20 = vadd.f32 %v2202_v19, %v2644_v6  ;;  %v1592_v22 = vpop.f32.mrb[71].mxu0 }
 0x2ef   : > { %1737 = vst.msk [vmem:[%s2651_s12 + $0x120] sm:$0xff] %vm1700_vm1, %v1590_v18  ;;  %v1593_v23 = vadd.f32 %v2644_v6, %v1592_v22 }
 0x2f0   : > { %1740 = vst.msk [vmem:[%s2651_s12 + $0x138] sm:$0xff] %vm1700_vm1, %v1601_v20 }
 0x2f1   : > { %1738 = vst.msk [vmem:[%s2651_s12 + $0x128] sm:$0xff] %vm1700_vm1, %v1593_v23 }
 0x2f3   : > { %v2205_v26 = vpop.f32.mrb[72].mxu0 }
 0x2f4   : > { %v1614_v28 = vadd.f32 %v2205_v26, %v2644_v6  ;;  %v1605_v30 = vpop.f32.mrb[73].mxu0 }
 0x2f5   : > { %v1606_v31 = vadd.f32 %v2644_v6, %v1605_v30  ;;  %v2206_v33 = vpop.f32.mrb[74].mxu0 }
 0x2f6   : > { %1743 = vst.msk [vmem:[%s2651_s12 + $0x150] sm:$0xff] %vm1700_vm1, %v1614_v28  ;;  %v1617_v34 = vadd.f32 %v2206_v33, %v2644_v6  ;;  %v1608_v35 = vpop.f32.mrb[75].mxu0 }
 0x2f7   : > { %1741 = vst.msk [vmem:[%s2651_s12 + $0x140] sm:$0xff] %vm1700_vm1, %v1606_v31  ;;  %v1609_v36 = vadd.f32 %v2644_v6, %v1608_v35 }
 0x2f8   : > { %1744 = vst.msk [vmem:[%s2651_s12 + $0x158] sm:$0xff] %vm1700_vm1, %v1617_v34 }
 0x2f9   : > { %1742 = vst.msk [vmem:[%s2651_s12 + $0x148] sm:$0xff] %vm1700_vm1, %v1609_v36 }
 0x2fb   : > { %v2209_v37 = vpop.f32.mrb[76].mxu0 }
 0x2fc   : > { %v1630_v38 = vadd.f32 %v2209_v37, %v2644_v6  ;;  %v1621_v42 = vpop.f32.mrb[77].mxu0 }
 0x2fd   : > { %v1622_v32 = vadd.f32 %v2644_v6, %v1621_v42  ;;  %v2210_v60 = vpop.f32.mrb[78].mxu0 }
 0x2fe   : > { %1747 = vst.msk [vmem:[%s2651_s12 + $0x170] sm:$0xff] %vm1700_vm1, %v1630_v38  ;;  %v1633_v63 = vadd.f32 %v2210_v60, %v2644_v6  ;;  %v1624_v24 = vpop.f32.mrb[79].mxu0 }
 0x2ff   : > { %1745 = vst.msk [vmem:[%s2651_s12 + $0x160] sm:$0xff] %vm1700_vm1, %v1622_v32  ;;  %v1625_v27 = vadd.f32 %v2644_v6, %v1624_v24 }
 0x300   : > { %1748 = vst.msk [vmem:[%s2651_s12 + $0x178] sm:$0xff] %vm1700_vm1, %v1633_v63 }
 0x301   : > { %1746 = vst.msk [vmem:[%s2651_s12 + $0x168] sm:$0xff] %vm1700_vm1, %v1625_v27 }
 0x303   : > { %v2213_v55 = vpop.f32.mrb[80].mxu0 }
 0x304   : > { %v1646_v58 = vadd.f32 %v2213_v55, %v2644_v6  ;;  %v1637_v21 = vpop.f32.mrb[81].mxu0 }
 0x305   : > { %v1638_v25 = vadd.f32 %v2644_v6, %v1637_v21  ;;  %v2214_v39 = vpop.f32.mrb[82].mxu0 }
 0x306   : > { %1751 = vst.msk [vmem:[%s2651_s12 + $0x190] sm:$0xff] %vm1700_vm1, %v1646_v58  ;;  %v1649_v40 = vadd.f32 %v2214_v39, %v2644_v6  ;;  %v1640_v41 = vpop.f32.mrb[83].mxu0 }
 0x307   : > { %1749 = vst.msk [vmem:[%s2651_s12 + $0x180] sm:$0xff] %vm1700_vm1, %v1638_v25  ;;  %v1641_v43 = vadd.f32 %v2644_v6, %v1640_v41 }
 0x308   : > { %1752 = vst.msk [vmem:[%s2651_s12 + $0x198] sm:$0xff] %vm1700_vm1, %v1649_v40 }
 0x309   : > { %1750 = vst.msk [vmem:[%s2651_s12 + $0x188] sm:$0xff] %vm1700_vm1, %v1641_v43 }
 0x30b   : > { %v2217_v44 = vpop.f32.mrb[84].mxu0 }
 0x30c   : > { %v1662_v45 = vadd.f32 %v2217_v44, %v2644_v6  ;;  %v1653_v46 = vpop.f32.mrb[85].mxu0 }
 0x30d   : > { %v1654_v47 = vadd.f32 %v2644_v6, %v1653_v46  ;;  %v2218_v48 = vpop.f32.mrb[86].mxu0 }
 0x30e   : > { %1755 = vst.msk [vmem:[%s2651_s12 + $0x1b0] sm:$0xff] %vm1700_vm1, %v1662_v45  ;;  %v1665_v49 = vadd.f32 %v2218_v48, %v2644_v6  ;;  %v1656_v50 = vpop.f32.mrb[87].mxu0 }
 0x30f   : > { %1753 = vst.msk [vmem:[%s2651_s12 + $0x1a0] sm:$0xff] %vm1700_vm1, %v1654_v47  ;;  %v1657_v51 = vadd.f32 %v2644_v6, %v1656_v50 }
 0x310   : > { %1756 = vst.msk [vmem:[%s2651_s12 + $0x1b8] sm:$0xff] %vm1700_vm1, %v1665_v49 }
 0x311   : > { %1754 = vst.msk [vmem:[%s2651_s12 + $0x1a8] sm:$0xff] %vm1700_vm1, %v1657_v51 }
 0x313   : > { %v2221_v52 = vpop.f32.mrb[88].mxu0 }
 0x314   : > { %v1678_v53 = vadd.f32 %v2221_v52, %v2644_v6  ;;  %v1669_v54 = vpop.f32.mrb[89].mxu0 }
 0x315   : > { %v1670_v56 = vadd.f32 %v2644_v6, %v1669_v54  ;;  %v2222_v57 = vpop.f32.mrb[90].mxu0 }
 0x316   : > { %1759 = vst.msk [vmem:[%s2651_s12 + $0x1d0] sm:$0xff] %vm1700_vm1, %v1678_v53  ;;  %v1681_v59 = vadd.f32 %v2222_v57, %v2644_v6  ;;  %v1672_v61 = vpop.f32.mrb[91].mxu0 }
 0x317   : > { %1757 = vst.msk [vmem:[%s2651_s12 + $0x1c0] sm:$0xff] %vm1700_vm1, %v1670_v56  ;;  %v1673_v62 = vadd.f32 %v2644_v6, %v1672_v61 }
 0x318   : > { %1760 = vst.msk [vmem:[%s2651_s12 + $0x1d8] sm:$0xff] %vm1700_vm1, %v1681_v59 }
 0x319   : > { %1758 = vst.msk [vmem:[%s2651_s12 + $0x1c8] sm:$0xff] %vm1700_vm1, %v1673_v62 }
 0x31b   : > { %v2225_v0 = vpop.f32.mrb[92].mxu0 }
 0x31c   : > { %v1694_v1 = vadd.f32 %v2225_v0, %v2644_v6  ;;  %v1685_v2 = vpop.f32.mrb[93].mxu0 }
 0x31d   : > { %v1686_v3 = vadd.f32 %v2644_v6, %v1685_v2  ;;  %v2226_v4 = vpop.f32.mrb[94].mxu0 }
 0x31e   : > { %1763 = vst.msk [vmem:[%s2651_s12 + $0x1f0] sm:$0xff] %vm1700_vm1, %v1694_v1  ;;  %v1697_v5 = vadd.f32 %v2226_v4, %v2644_v6  ;;  %v1688_v29 = vpop.f32.mrb[95].mxu0 }
 0x31f   : > { %1761 = vst.msk [vmem:[%s2651_s12 + $0x1e0] sm:$0xff] %vm1700_vm1, %v1686_v3  ;;  %v1689_v7 = vadd.f32 %v2644_v6, %v1688_v29 }
 0x320   : > { %1764 = vst.msk [vmem:[%s2651_s12 + $0x1f8] sm:$0xff] %vm1700_vm1, %v1697_v5 }
 0x321   : > { %1762 = vst.msk [vmem:[%s2651_s12 + $0x1e8] sm:$0xff] %vm1700_vm1, %v1689_v7 }
 0x322 PF: > { %s17_s24 = sadd.s32 1, %s2263_s24  }
 0x323   : > { %p14_p4 = scmp.ge.s32.totalorder %s17_s24, 4  }
 0x325   :  { %16 = sbr.rel (!%p14_p4) target bundleno = 1 (0x1), region = 78 }

</bundles_post_ra>
